<compile_context>
chip_gen: v6e
topology: v6e:2x2x1
jax: 0.10.0
libtpu: 0.0.40
codegen_flags: <defaults>
</compile_context>

<pallas_src>
import functools
import math

import jax
import jax.numpy as jnp
from jax.experimental import pallas as pl
from jax.experimental.pallas import tpu as pltpu


def _conv_t_out(t_in, k=3, stride=2, pad=1):
    return (t_in + 2 * pad - k) // stride + 1


# ----------------------------------------------------------------------------
# Fused Pallas kernel: per grid step processes B_BLK batch elements end-to-end.
# ----------------------------------------------------------------------------
def _disc_kernel(x_ref,
                 s1, w1, b1, s2, w2, b2, s3, w3, b3,
                 fw1, fb1, fw2, fb2, fw3, fb3, fw4, fb4,
                 o_ref, *, b_blk, t3):
    # Stack the batch block along the time (sublane) axis so every matmul
    # below is batched for free: rows are (batch, time) pairs.
    h = jnp.concatenate([x_ref[b] for b in range(b_blk)], axis=0)  # (b_blk*T, 28)

    # Three strided conv layers (k=3, stride=2, pad=1).  For tap j:
    #   taps_j = Sblk_j @ h   (block-diagonal stride-2 gather, zero padding)
    #   acc   += taps_j @ W_j (channel contraction on the MXU)
    for s_ref, w_ref, b_ref in ((s1, w1, b1), (s2, w2, b2), (s3, w3, b3)):
        acc = jnp.dot(
            jnp.dot(s_ref[0], h, preferred_element_type=jnp.float32),
            w_ref[0], preferred_element_type=jnp.float32)
        for j in (1, 2):
            acc = acc + jnp.dot(
                jnp.dot(s_ref[j], h, preferred_element_type=jnp.float32),
                w_ref[j], preferred_element_type=jnp.float32)
        h = jnp.maximum(acc + b_ref[...], 0.0)          # (b_blk*T_out, Cout)

    # FC head (batched over all (batch, time) rows in this block).
    for w_ref, b_ref in ((fw1, fb1), (fw2, fb2), (fw3, fb3)):
        h = jnp.maximum(
            jnp.dot(h, w_ref[...], preferred_element_type=jnp.float32)
            + b_ref[...], 0.0)                          # (b_blk*T3, 32)

    # mean over time commutes with the final affine layer:
    #   mean_t(h W4 + b4) == mean_t(h) W4 + b4  -> reduce first, tiny matmul.
    m = jnp.concatenate(
        [jnp.mean(h[b * t3:(b + 1) * t3], axis=0, keepdims=True)
         for b in range(b_blk)], axis=0)                # (b_blk, 32)
    y = jnp.dot(m, fw4[...], preferred_element_type=jnp.float32) + fb4[...]
    for b in range(b_blk):
        o_ref[b] = y[b:b + 1, :]                        # (1, 1) per-element store


# ----------------------------------------------------------------------------
# One-time parameter preparation (weights pre-laid-out, selectors precomputed)
# ----------------------------------------------------------------------------
def prepare_params(params, T, batch_block=1):
    """PyTorch-layout params -> kernel-ready, MXU-layout params.

    batch_block: number of batch elements processed per grid step; the conv
    tap-gather selectors are built block-diagonal for exactly this block size.
    """
    conv = []
    t_in = T
    eye = jnp.eye(batch_block, dtype=jnp.float32)
    for i in (1, 2, 3):
        w = params[f"conv{i}_w"]                 # (Cout, Cin, K) PyTorch layout
        b = params[f"conv{i}_b"]                 # (Cout,)
        cout, cin, k = w.shape
        t_out = _conv_t_out(t_in)                # stride=2, pad=1
        t_o = jnp.arange(t_out)[:, None]
        t = jnp.arange(t_in)[None, :]
        # S_j[t_o, t] = 1 iff t == 2*t_o + j - 1 (pad=1; OOB rows -> all-zero),
        # block-diagonalized over the batch block with kron(I, S_j).
        sel = jnp.stack(
            [jnp.kron(eye, (t == (2 * t_o + j - 1)).astype(jnp.float32))
             for j in range(k)],
            axis=0)                              # (K, bb*T_out, bb*T_in)
        w_taps = jnp.stack([w[:, :, j].T for j in range(k)], axis=0)  # (K, Cin, Cout)
        conv.append((sel, w_taps, b.reshape(1, cout)))
        t_in = t_out
    fc = [(params[f"fc{i}_w"].T, params[f"fc{i}_b"].reshape(1, -1))
          for i in (1, 2, 3, 4)]                 # (in, out), (1, out)
    return {"conv": conv, "fc": fc}


def _pick_batch_block(B, max_blk=8):
    """Largest divisor of B that is <= max_blk (keeps in-kernel unroll small)."""
    for d in range(min(B, max_blk), 0, -1):
        if B % d == 0:
            return d
    return 1


def _cost_estimate(kparams, n_steps, x_bytes, out_bytes):
    flops = 0
    bytes_accessed = x_bytes + out_bytes
    for sel, wt, b in kparams["conv"]:
        k, m, n = sel.shape
        cin, cout = wt.shape[1], wt.shape[2]
        flops += n_steps * k * 2 * (m * n * cin + m * cin * cout)
        bytes_accessed += 4 * (sel.size + wt.size + b.size)
    rows = kparams["conv"][-1][0].shape[1]       # b_blk * T3
    for w, b in kparams["fc"]:
        flops += n_steps * 2 * rows * w.shape[0] * w.shape[1]
        bytes_accessed += 4 * (w.size + b.size)
    return pl.CostEstimate(flops=int(flops), transcendentals=0,
                           bytes_accessed=int(bytes_accessed))


# ----------------------------------------------------------------------------
# Forward pass (single pallas_call; no per-call weight transposes)
# ----------------------------------------------------------------------------
def discriminator_forward(x, kparams):
    """x: (B, T, J, F) with J*F == 28.  Returns (B, 1)."""
    B, T = x.shape[0], x.shape[1]
    h3d = x.reshape(B, T, -1).astype(jnp.float32)   # (B, T, 28)  flatten(-2)
    C = h3d.shape[2]

    # Static bookkeeping, derived from the prepared selector shapes.
    t1 = _conv_t_out(T)
    t2 = _conv_t_out(t1)
    t3 = _conv_t_out(t2)
    sel1 = kparams["conv"][0][0]
    b_blk = sel1.shape[1] // t1
    assert sel1.shape[2] == b_blk * T, "params were prepared for a different T"
    assert B % b_blk == 0, "batch must be a multiple of the prepared batch block"
    n_steps = B // b_blk

    const_inputs = []
    for sel, wt, b in kparams["conv"]:
        const_inputs += [sel, wt, b]
    for w, b in kparams["fc"]:
        const_inputs += [w, b]

    def _resident(a):
        nd = a.ndim
        return pl.BlockSpec(a.shape, lambda g, _nd=nd: (0,) * _nd)

    grid_spec = pltpu.PrefetchScalarGridSpec(
        num_scalar_prefetch=0,
        grid=(n_steps,),
        in_specs=[pl.BlockSpec((b_blk, T, C), lambda g: (g, 0, 0))]
                 + [_resident(a) for a in const_inputs],
        out_specs=pl.BlockSpec((b_blk, 1, 1), lambda g: (g, 0, 0)),
    )

    kernel = functools.partial(_disc_kernel, b_blk=b_blk, t3=t3)
    out = pl.pallas_call(
        kernel,
        out_shape=jax.ShapeDtypeStruct((B, 1, 1), jnp.float32),
        grid_spec=grid_spec,
        compiler_params=pltpu.CompilerParams(
            dimension_semantics=("parallel",)),
        cost_estimate=_cost_estimate(kparams, n_steps, h3d.size * 4, B * 4),
    )(h3d, *const_inputs)
    return out.reshape(B, 1)


# ----------------------------------------------------------------------------
# Deterministic parameter init (PyTorch-style uniform(-1/sqrt(fan_in), ...))
# ----------------------------------------------------------------------------
def _uniform(key, shape, bound):
    return jax.random.uniform(key, shape, jnp.float32, -bound, bound)


def init_params(key):
    keys = jax.random.split(key, 14)
    params = {}
    convs = [(64, 28, 3), (128, 64, 3), (256, 128, 3)]
    for i, (co, ci, k) in enumerate(convs):
        bnd = 1.0 / math.sqrt(ci * k)
        params[f"conv{i+1}_w"] = _uniform(keys[2 * i], (co, ci, k), bnd)
        params[f"conv{i+1}_b"] = _uniform(keys[2 * i + 1], (co,), bnd)
    fcs = [(128, 256), (64, 128), (32, 64), (1, 32)]
    for i, (o, inp) in enumerate(fcs):
        bnd = 1.0 / math.sqrt(inp)
        params[f"fc{i+1}_w"] = _uniform(keys[6 + 2 * i], (o, inp), bnd)
        params[f"fc{i+1}_b"] = _uniform(keys[6 + 2 * i + 1], (o,), bnd)
    return params


# ----------------------------------------------------------------------------
# Pure-JAX reference (mirrors the PyTorch forward) for correctness checking
# ----------------------------------------------------------------------------
def ref_forward(x, params):
    B = x.shape[0]
    h = x.reshape(B, x.shape[1], -1)          # (B, T, 28)
    h = jnp.transpose(h, (0, 2, 1))           # (B, 28, T)  == permute(0, 2, 1)
    for i in (1, 2, 3):
        w = params[f"conv{i}_w"]
        b = params[f"conv{i}_b"]
        h = jax.lax.conv_general_dilated(
            h, w, window_strides=(2,), padding=[(1, 1)],
            dimension_numbers=("NCH", "OIH", "NCH"),
        )
        h = jax.nn.relu(h + b[None, :, None])
    h = jnp.transpose(h, (0, 2, 1))           # (B, T3, 256)
    for i in (1, 2, 3):
        h = jax.nn.relu(h @ params[f"fc{i}_w"].T + params[f"fc{i}_b"])
    h = h @ params["fc4_w"].T + params["fc4_b"]
    return h.mean(axis=1)                     # (B, 1)


if __name__ == "__main__":
    key = jax.random.PRNGKey(0)
    pkey, xkey = jax.random.split(key)
    params = init_params(pkey)

    # B=2, T=16 timesteps, 4 joints x 7 features (pos+quat) -> 28 channels
    x = jax.random.normal(xkey, (2, 16, 4, 7), dtype=jnp.float32)

    b_blk = _pick_batch_block(x.shape[0])             # batch elements / grid step
    kparams = prepare_params(params, T=x.shape[1], batch_block=b_blk)
    fwd = jax.jit(discriminator_forward)

    out = jax.block_until_ready(fwd(x, kparams))
    assert out.shape == (2, 1), out.shape

    ref = ref_forward(x, params)
    if not jnp.allclose(out, ref, atol=1e-3, rtol=1e-3):
        raise AssertionError(f"mismatch: pallas={out} ref={ref}")

    print("KERNEL_OK")
</pallas_src>

<mosaic_0001>
module attributes {stable_mosaic.version = 11 : i64} {
  func.func @_disc_kernel(%arg0: i32, %arg1: memref<2x16x28xf32, #tpu.memory_space<vmem>>, %arg2: memref<3x16x32xf32, #tpu.memory_space<vmem>>, %arg3: memref<3x28x64xf32, #tpu.memory_space<vmem>>, %arg4: memref<1x64xf32, #tpu.memory_space<vmem>>, %arg5: memref<3x8x16xf32, #tpu.memory_space<vmem>>, %arg6: memref<3x64x128xf32, #tpu.memory_space<vmem>>, %arg7: memref<1x128xf32, #tpu.memory_space<vmem>>, %arg8: memref<3x4x8xf32, #tpu.memory_space<vmem>>, %arg9: memref<3x128x256xf32, #tpu.memory_space<vmem>>, %arg10: memref<1x256xf32, #tpu.memory_space<vmem>>, %arg11: memref<256x128xf32, #tpu.memory_space<vmem>>, %arg12: memref<1x128xf32, #tpu.memory_space<vmem>>, %arg13: memref<128x64xf32, #tpu.memory_space<vmem>>, %arg14: memref<1x64xf32, #tpu.memory_space<vmem>>, %arg15: memref<64x32xf32, #tpu.memory_space<vmem>>, %arg16: memref<1x32xf32, #tpu.memory_space<vmem>>, %arg17: memref<32x1xf32, #tpu.memory_space<vmem>>, %arg18: memref<1x1xf32, #tpu.memory_space<vmem>>, %arg19: memref<2x1x1xf32, #tpu.memory_space<vmem>>) attributes {dimension_semantics = [#tpu.dimension_semantics<parallel>], iteration_bounds = array<i64: 1>, scalar_prefetch = 0 : i64, scratch_operands = 0 : i64, tpu.core_type = #tpu.core_type<tc>, window_params = [{transform_indices = @transform_0, window_bounds = array<i64: 2, 16, 28>}, {pipeline_mode = #tpu.pipeline_mode<synchronous>, transform_indices = @transform_1, window_bounds = array<i64: 3, 16, 32>}, {pipeline_mode = #tpu.pipeline_mode<synchronous>, transform_indices = @transform_2, window_bounds = array<i64: 3, 28, 64>}, {pipeline_mode = #tpu.pipeline_mode<synchronous>, transform_indices = @transform_3, window_bounds = array<i64: 1, 64>}, {pipeline_mode = #tpu.pipeline_mode<synchronous>, transform_indices = @transform_4, window_bounds = array<i64: 3, 8, 16>}, {pipeline_mode = #tpu.pipeline_mode<synchronous>, transform_indices = @transform_5, window_bounds = array<i64: 3, 64, 128>}, {pipeline_mode = #tpu.pipeline_mode<synchronous>, transform_indices = @transform_6, window_bounds = array<i64: 1, 128>}, {pipeline_mode = #tpu.pipeline_mode<synchronous>, transform_indices = @transform_7, window_bounds = array<i64: 3, 4, 8>}, {pipeline_mode = #tpu.pipeline_mode<synchronous>, transform_indices = @transform_8, window_bounds = array<i64: 3, 128, 256>}, {pipeline_mode = #tpu.pipeline_mode<synchronous>, transform_indices = @transform_9, window_bounds = array<i64: 1, 256>}, {pipeline_mode = #tpu.pipeline_mode<synchronous>, transform_indices = @transform_10, window_bounds = array<i64: 256, 128>}, {pipeline_mode = #tpu.pipeline_mode<synchronous>, transform_indices = @transform_11, window_bounds = array<i64: 1, 128>}, {pipeline_mode = #tpu.pipeline_mode<synchronous>, transform_indices = @transform_12, window_bounds = array<i64: 128, 64>}, {pipeline_mode = #tpu.pipeline_mode<synchronous>, transform_indices = @transform_13, window_bounds = array<i64: 1, 64>}, {pipeline_mode = #tpu.pipeline_mode<synchronous>, transform_indices = @transform_14, window_bounds = array<i64: 64, 32>}, {pipeline_mode = #tpu.pipeline_mode<synchronous>, transform_indices = @transform_15, window_bounds = array<i64: 1, 32>}, {pipeline_mode = #tpu.pipeline_mode<synchronous>, transform_indices = @transform_16, window_bounds = array<i64: 32, 1>}, {pipeline_mode = #tpu.pipeline_mode<synchronous>, transform_indices = @transform_17, window_bounds = array<i64: 1, 1>}, {transform_indices = @transform_18, window_bounds = array<i64: 2, 1, 1>}]} {
    %c0 = arith.constant 0 : index
    %c0_0 = arith.constant 0 : index
    %c0_1 = arith.constant 0 : index
    %0 = vector.load %arg1[%c0, %c0_0, %c0_1] : memref<2x16x28xf32, #tpu.memory_space<vmem>>, vector<1x16x28xf32>
    %1 = vector.shape_cast %0 : vector<1x16x28xf32> to vector<16x28xf32>
    %c1 = arith.constant 1 : index
    %c0_2 = arith.constant 0 : index
    %c0_3 = arith.constant 0 : index
    %2 = vector.load %arg1[%c1, %c0_2, %c0_3] : memref<2x16x28xf32, #tpu.memory_space<vmem>>, vector<1x16x28xf32>
    %3 = vector.shape_cast %2 : vector<1x16x28xf32> to vector<16x28xf32>
    %4 = tpu.concatenate %1, %3 in 0 : vector<16x28xf32>, vector<16x28xf32> -> vector<32x28xf32>
    %c0_4 = arith.constant 0 : index
    %c0_5 = arith.constant 0 : index
    %c0_6 = arith.constant 0 : index
    %5 = vector.load %arg2[%c0_4, %c0_5, %c0_6] : memref<3x16x32xf32, #tpu.memory_space<vmem>>, vector<1x16x32xf32>
    %6 = vector.shape_cast %5 : vector<1x16x32xf32> to vector<16x32xf32>
    %cst = arith.constant dense<0.000000e+00> : vector<16x28xf32>
    %7 = tpu.matmul %6, %4, %cst {dimension_numbers = #tpu.dot_dimension_numbers<[1], [0], [0], [1], [0, 0, 1, 1], [], []>} : vector<16x32xf32>, vector<32x28xf32>, vector<16x28xf32> -> vector<16x28xf32>
    %c0_7 = arith.constant 0 : index
    %c0_8 = arith.constant 0 : index
    %c0_9 = arith.constant 0 : index
    %8 = vector.load %arg3[%c0_7, %c0_8, %c0_9] : memref<3x28x64xf32, #tpu.memory_space<vmem>>, vector<1x28x64xf32>
    %9 = vector.shape_cast %8 : vector<1x28x64xf32> to vector<28x64xf32>
    %cst_10 = arith.constant dense<0.000000e+00> : vector<16x64xf32>
    %10 = tpu.matmul %7, %9, %cst_10 {dimension_numbers = #tpu.dot_dimension_numbers<[1], [0], [0], [1], [0, 0, 1, 1], [], []>} : vector<16x28xf32>, vector<28x64xf32>, vector<16x64xf32> -> vector<16x64xf32>
    %c1_11 = arith.constant 1 : index
    %c0_12 = arith.constant 0 : index
    %c0_13 = arith.constant 0 : index
    %11 = vector.load %arg2[%c1_11, %c0_12, %c0_13] : memref<3x16x32xf32, #tpu.memory_space<vmem>>, vector<1x16x32xf32>
    %12 = vector.shape_cast %11 : vector<1x16x32xf32> to vector<16x32xf32>
    %cst_14 = arith.constant dense<0.000000e+00> : vector<16x28xf32>
    %13 = tpu.matmul %12, %4, %cst_14 {dimension_numbers = #tpu.dot_dimension_numbers<[1], [0], [0], [1], [0, 0, 1, 1], [], []>} : vector<16x32xf32>, vector<32x28xf32>, vector<16x28xf32> -> vector<16x28xf32>
    %c1_15 = arith.constant 1 : index
    %c0_16 = arith.constant 0 : index
    %c0_17 = arith.constant 0 : index
    %14 = vector.load %arg3[%c1_15, %c0_16, %c0_17] : memref<3x28x64xf32, #tpu.memory_space<vmem>>, vector<1x28x64xf32>
    %15 = vector.shape_cast %14 : vector<1x28x64xf32> to vector<28x64xf32>
    %cst_18 = arith.constant dense<0.000000e+00> : vector<16x64xf32>
    %16 = tpu.matmul %13, %15, %cst_18 {dimension_numbers = #tpu.dot_dimension_numbers<[1], [0], [0], [1], [0, 0, 1, 1], [], []>} : vector<16x28xf32>, vector<28x64xf32>, vector<16x64xf32> -> vector<16x64xf32>
    %17 = arith.addf %10, %16 : vector<16x64xf32>
    %c2 = arith.constant 2 : index
    %c0_19 = arith.constant 0 : index
    %c0_20 = arith.constant 0 : index
    %18 = vector.load %arg2[%c2, %c0_19, %c0_20] : memref<3x16x32xf32, #tpu.memory_space<vmem>>, vector<1x16x32xf32>
    %19 = vector.shape_cast %18 : vector<1x16x32xf32> to vector<16x32xf32>
    %cst_21 = arith.constant dense<0.000000e+00> : vector<16x28xf32>
    %20 = tpu.matmul %19, %4, %cst_21 {dimension_numbers = #tpu.dot_dimension_numbers<[1], [0], [0], [1], [0, 0, 1, 1], [], []>} : vector<16x32xf32>, vector<32x28xf32>, vector<16x28xf32> -> vector<16x28xf32>
    %c2_22 = arith.constant 2 : index
    %c0_23 = arith.constant 0 : index
    %c0_24 = arith.constant 0 : index
    %21 = vector.load %arg3[%c2_22, %c0_23, %c0_24] : memref<3x28x64xf32, #tpu.memory_space<vmem>>, vector<1x28x64xf32>
    %22 = vector.shape_cast %21 : vector<1x28x64xf32> to vector<28x64xf32>
    %cst_25 = arith.constant dense<0.000000e+00> : vector<16x64xf32>
    %23 = tpu.matmul %20, %22, %cst_25 {dimension_numbers = #tpu.dot_dimension_numbers<[1], [0], [0], [1], [0, 0, 1, 1], [], []>} : vector<16x28xf32>, vector<28x64xf32>, vector<16x64xf32> -> vector<16x64xf32>
    %24 = arith.addf %17, %23 : vector<16x64xf32>
    %c0_26 = arith.constant 0 : index
    %c0_27 = arith.constant 0 : index
    %25 = vector.load %arg4[%c0_26, %c0_27] : memref<1x64xf32, #tpu.memory_space<vmem>>, vector<1x64xf32>
    %26 = vector.broadcast %25 : vector<1x64xf32> to vector<16x64xf32>
    %27 = arith.addf %24, %26 : vector<16x64xf32>
    %cst_28 = arith.constant 0.000000e+00 : f32
    %28 = vector.broadcast %cst_28 : f32 to vector<16x64xf32>
    %29 = arith.maximumf %27, %28 : vector<16x64xf32>
    %c0_29 = arith.constant 0 : index
    %c0_30 = arith.constant 0 : index
    %c0_31 = arith.constant 0 : index
    %30 = vector.load %arg5[%c0_29, %c0_30, %c0_31] : memref<3x8x16xf32, #tpu.memory_space<vmem>>, vector<1x8x16xf32>
    %31 = vector.shape_cast %30 : vector<1x8x16xf32> to vector<8x16xf32>
    %cst_32 = arith.constant dense<0.000000e+00> : vector<8x64xf32>
    %32 = tpu.matmul %31, %29, %cst_32 {dimension_numbers = #tpu.dot_dimension_numbers<[1], [0], [0], [1], [0, 0, 1, 1], [], []>} : vector<8x16xf32>, vector<16x64xf32>, vector<8x64xf32> -> vector<8x64xf32>
    %c0_33 = arith.constant 0 : index
    %c0_34 = arith.constant 0 : index
    %c0_35 = arith.constant 0 : index
    %33 = vector.load %arg6[%c0_33, %c0_34, %c0_35] : memref<3x64x128xf32, #tpu.memory_space<vmem>>, vector<1x64x128xf32>
    %34 = vector.shape_cast %33 : vector<1x64x128xf32> to vector<64x128xf32>
    %cst_36 = arith.constant dense<0.000000e+00> : vector<8x128xf32>
    %35 = tpu.matmul %32, %34, %cst_36 {dimension_numbers = #tpu.dot_dimension_numbers<[1], [0], [0], [1], [0, 0, 1, 1], [], []>} : vector<8x64xf32>, vector<64x128xf32>, vector<8x128xf32> -> vector<8x128xf32>
    %c1_37 = arith.constant 1 : index
    %c0_38 = arith.constant 0 : index
    %c0_39 = arith.constant 0 : index
    %36 = vector.load %arg5[%c1_37, %c0_38, %c0_39] : memref<3x8x16xf32, #tpu.memory_space<vmem>>, vector<1x8x16xf32>
    %37 = vector.shape_cast %36 : vector<1x8x16xf32> to vector<8x16xf32>
    %cst_40 = arith.constant dense<0.000000e+00> : vector<8x64xf32>
    %38 = tpu.matmul %37, %29, %cst_40 {dimension_numbers = #tpu.dot_dimension_numbers<[1], [0], [0], [1], [0, 0, 1, 1], [], []>} : vector<8x16xf32>, vector<16x64xf32>, vector<8x64xf32> -> vector<8x64xf32>
    %c1_41 = arith.constant 1 : index
    %c0_42 = arith.constant 0 : index
    %c0_43 = arith.constant 0 : index
    %39 = vector.load %arg6[%c1_41, %c0_42, %c0_43] : memref<3x64x128xf32, #tpu.memory_space<vmem>>, vector<1x64x128xf32>
    %40 = vector.shape_cast %39 : vector<1x64x128xf32> to vector<64x128xf32>
    %cst_44 = arith.constant dense<0.000000e+00> : vector<8x128xf32>
    %41 = tpu.matmul %38, %40, %cst_44 {dimension_numbers = #tpu.dot_dimension_numbers<[1], [0], [0], [1], [0, 0, 1, 1], [], []>} : vector<8x64xf32>, vector<64x128xf32>, vector<8x128xf32> -> vector<8x128xf32>
    %42 = arith.addf %35, %41 : vector<8x128xf32>
    %c2_45 = arith.constant 2 : index
    %c0_46 = arith.constant 0 : index
    %c0_47 = arith.constant 0 : index
    %43 = vector.load %arg5[%c2_45, %c0_46, %c0_47] : memref<3x8x16xf32, #tpu.memory_space<vmem>>, vector<1x8x16xf32>
    %44 = vector.shape_cast %43 : vector<1x8x16xf32> to vector<8x16xf32>
    %cst_48 = arith.constant dense<0.000000e+00> : vector<8x64xf32>
    %45 = tpu.matmul %44, %29, %cst_48 {dimension_numbers = #tpu.dot_dimension_numbers<[1], [0], [0], [1], [0, 0, 1, 1], [], []>} : vector<8x16xf32>, vector<16x64xf32>, vector<8x64xf32> -> vector<8x64xf32>
    %c2_49 = arith.constant 2 : index
    %c0_50 = arith.constant 0 : index
    %c0_51 = arith.constant 0 : index
    %46 = vector.load %arg6[%c2_49, %c0_50, %c0_51] : memref<3x64x128xf32, #tpu.memory_space<vmem>>, vector<1x64x128xf32>
    %47 = vector.shape_cast %46 : vector<1x64x128xf32> to vector<64x128xf32>
    %cst_52 = arith.constant dense<0.000000e+00> : vector<8x128xf32>
    %48 = tpu.matmul %45, %47, %cst_52 {dimension_numbers = #tpu.dot_dimension_numbers<[1], [0], [0], [1], [0, 0, 1, 1], [], []>} : vector<8x64xf32>, vector<64x128xf32>, vector<8x128xf32> -> vector<8x128xf32>
    %49 = arith.addf %42, %48 : vector<8x128xf32>
    %c0_53 = arith.constant 0 : index
    %c0_54 = arith.constant 0 : index
    %50 = vector.load %arg7[%c0_53, %c0_54] : memref<1x128xf32, #tpu.memory_space<vmem>>, vector<1x128xf32>
    %51 = vector.broadcast %50 : vector<1x128xf32> to vector<8x128xf32>
    %52 = arith.addf %49, %51 : vector<8x128xf32>
    %cst_55 = arith.constant 0.000000e+00 : f32
    %53 = vector.broadcast %cst_55 : f32 to vector<8x128xf32>
    %54 = arith.maximumf %52, %53 : vector<8x128xf32>
    %c0_56 = arith.constant 0 : index
    %c0_57 = arith.constant 0 : index
    %c0_58 = arith.constant 0 : index
    %55 = vector.load %arg8[%c0_56, %c0_57, %c0_58] : memref<3x4x8xf32, #tpu.memory_space<vmem>>, vector<1x4x8xf32>
    %56 = vector.shape_cast %55 : vector<1x4x8xf32> to vector<4x8xf32>
    %cst_59 = arith.constant dense<0.000000e+00> : vector<4x128xf32>
    %57 = tpu.matmul %56, %54, %cst_59 {dimension_numbers = #tpu.dot_dimension_numbers<[1], [0], [0], [1], [0, 0, 1, 1], [], []>} : vector<4x8xf32>, vector<8x128xf32>, vector<4x128xf32> -> vector<4x128xf32>
    %c0_60 = arith.constant 0 : index
    %c0_61 = arith.constant 0 : index
    %c0_62 = arith.constant 0 : index
    %58 = vector.load %arg9[%c0_60, %c0_61, %c0_62] : memref<3x128x256xf32, #tpu.memory_space<vmem>>, vector<1x128x256xf32>
    %59 = vector.shape_cast %58 : vector<1x128x256xf32> to vector<128x256xf32>
    %cst_63 = arith.constant dense<0.000000e+00> : vector<4x256xf32>
    %60 = tpu.matmul %57, %59, %cst_63 {dimension_numbers = #tpu.dot_dimension_numbers<[1], [0], [0], [1], [0, 0, 1, 1], [], []>} : vector<4x128xf32>, vector<128x256xf32>, vector<4x256xf32> -> vector<4x256xf32>
    %c1_64 = arith.constant 1 : index
    %c0_65 = arith.constant 0 : index
    %c0_66 = arith.constant 0 : index
    %61 = vector.load %arg8[%c1_64, %c0_65, %c0_66] : memref<3x4x8xf32, #tpu.memory_space<vmem>>, vector<1x4x8xf32>
    %62 = vector.shape_cast %61 : vector<1x4x8xf32> to vector<4x8xf32>
    %cst_67 = arith.constant dense<0.000000e+00> : vector<4x128xf32>
    %63 = tpu.matmul %62, %54, %cst_67 {dimension_numbers = #tpu.dot_dimension_numbers<[1], [0], [0], [1], [0, 0, 1, 1], [], []>} : vector<4x8xf32>, vector<8x128xf32>, vector<4x128xf32> -> vector<4x128xf32>
    %c1_68 = arith.constant 1 : index
    %c0_69 = arith.constant 0 : index
    %c0_70 = arith.constant 0 : index
    %64 = vector.load %arg9[%c1_68, %c0_69, %c0_70] : memref<3x128x256xf32, #tpu.memory_space<vmem>>, vector<1x128x256xf32>
    %65 = vector.shape_cast %64 : vector<1x128x256xf32> to vector<128x256xf32>
    %cst_71 = arith.constant dense<0.000000e+00> : vector<4x256xf32>
    %66 = tpu.matmul %63, %65, %cst_71 {dimension_numbers = #tpu.dot_dimension_numbers<[1], [0], [0], [1], [0, 0, 1, 1], [], []>} : vector<4x128xf32>, vector<128x256xf32>, vector<4x256xf32> -> vector<4x256xf32>
    %67 = arith.addf %60, %66 : vector<4x256xf32>
    %c2_72 = arith.constant 2 : index
    %c0_73 = arith.constant 0 : index
    %c0_74 = arith.constant 0 : index
    %68 = vector.load %arg8[%c2_72, %c0_73, %c0_74] : memref<3x4x8xf32, #tpu.memory_space<vmem>>, vector<1x4x8xf32>
    %69 = vector.shape_cast %68 : vector<1x4x8xf32> to vector<4x8xf32>
    %cst_75 = arith.constant dense<0.000000e+00> : vector<4x128xf32>
    %70 = tpu.matmul %69, %54, %cst_75 {dimension_numbers = #tpu.dot_dimension_numbers<[1], [0], [0], [1], [0, 0, 1, 1], [], []>} : vector<4x8xf32>, vector<8x128xf32>, vector<4x128xf32> -> vector<4x128xf32>
    %c2_76 = arith.constant 2 : index
    %c0_77 = arith.constant 0 : index
    %c0_78 = arith.constant 0 : index
    %71 = vector.load %arg9[%c2_76, %c0_77, %c0_78] : memref<3x128x256xf32, #tpu.memory_space<vmem>>, vector<1x128x256xf32>
    %72 = vector.shape_cast %71 : vector<1x128x256xf32> to vector<128x256xf32>
    %cst_79 = arith.constant dense<0.000000e+00> : vector<4x256xf32>
    %73 = tpu.matmul %70, %72, %cst_79 {dimension_numbers = #tpu.dot_dimension_numbers<[1], [0], [0], [1], [0, 0, 1, 1], [], []>} : vector<4x128xf32>, vector<128x256xf32>, vector<4x256xf32> -> vector<4x256xf32>
    %74 = arith.addf %67, %73 : vector<4x256xf32>
    %c0_80 = arith.constant 0 : index
    %c0_81 = arith.constant 0 : index
    %75 = vector.load %arg10[%c0_80, %c0_81] : memref<1x256xf32, #tpu.memory_space<vmem>>, vector<1x256xf32>
    %76 = vector.broadcast %75 : vector<1x256xf32> to vector<4x256xf32>
    %77 = arith.addf %74, %76 : vector<4x256xf32>
    %cst_82 = arith.constant 0.000000e+00 : f32
    %78 = vector.broadcast %cst_82 : f32 to vector<4x256xf32>
    %79 = arith.maximumf %77, %78 : vector<4x256xf32>
    %c0_83 = arith.constant 0 : index
    %c0_84 = arith.constant 0 : index
    %80 = vector.load %arg11[%c0_83, %c0_84] : memref<256x128xf32, #tpu.memory_space<vmem>>, vector<256x128xf32>
    %cst_85 = arith.constant dense<0.000000e+00> : vector<4x128xf32>
    %81 = tpu.matmul %79, %80, %cst_85 {dimension_numbers = #tpu.dot_dimension_numbers<[1], [0], [0], [1], [0, 0, 1, 1], [], []>} : vector<4x256xf32>, vector<256x128xf32>, vector<4x128xf32> -> vector<4x128xf32>
    %c0_86 = arith.constant 0 : index
    %c0_87 = arith.constant 0 : index
    %82 = vector.load %arg12[%c0_86, %c0_87] : memref<1x128xf32, #tpu.memory_space<vmem>>, vector<1x128xf32>
    %83 = vector.broadcast %82 : vector<1x128xf32> to vector<4x128xf32>
    %84 = arith.addf %81, %83 : vector<4x128xf32>
    %cst_88 = arith.constant 0.000000e+00 : f32
    %85 = vector.broadcast %cst_88 : f32 to vector<4x128xf32>
    %86 = arith.maximumf %84, %85 : vector<4x128xf32>
    %c0_89 = arith.constant 0 : index
    %c0_90 = arith.constant 0 : index
    %87 = vector.load %arg13[%c0_89, %c0_90] : memref<128x64xf32, #tpu.memory_space<vmem>>, vector<128x64xf32>
    %cst_91 = arith.constant dense<0.000000e+00> : vector<4x64xf32>
    %88 = tpu.matmul %86, %87, %cst_91 {dimension_numbers = #tpu.dot_dimension_numbers<[1], [0], [0], [1], [0, 0, 1, 1], [], []>} : vector<4x128xf32>, vector<128x64xf32>, vector<4x64xf32> -> vector<4x64xf32>
    %c0_92 = arith.constant 0 : index
    %c0_93 = arith.constant 0 : index
    %89 = vector.load %arg14[%c0_92, %c0_93] : memref<1x64xf32, #tpu.memory_space<vmem>>, vector<1x64xf32>
    %90 = vector.broadcast %89 : vector<1x64xf32> to vector<4x64xf32>
    %91 = arith.addf %88, %90 : vector<4x64xf32>
    %cst_94 = arith.constant 0.000000e+00 : f32
    %92 = vector.broadcast %cst_94 : f32 to vector<4x64xf32>
    %93 = arith.maximumf %91, %92 : vector<4x64xf32>
    %c0_95 = arith.constant 0 : index
    %c0_96 = arith.constant 0 : index
    %94 = vector.load %arg15[%c0_95, %c0_96] : memref<64x32xf32, #tpu.memory_space<vmem>>, vector<64x32xf32>
    %cst_97 = arith.constant dense<0.000000e+00> : vector<4x32xf32>
    %95 = tpu.matmul %93, %94, %cst_97 {dimension_numbers = #tpu.dot_dimension_numbers<[1], [0], [0], [1], [0, 0, 1, 1], [], []>} : vector<4x64xf32>, vector<64x32xf32>, vector<4x32xf32> -> vector<4x32xf32>
    %c0_98 = arith.constant 0 : index
    %c0_99 = arith.constant 0 : index
    %96 = vector.load %arg16[%c0_98, %c0_99] : memref<1x32xf32, #tpu.memory_space<vmem>>, vector<1x32xf32>
    %97 = vector.broadcast %96 : vector<1x32xf32> to vector<4x32xf32>
    %98 = arith.addf %95, %97 : vector<4x32xf32>
    %cst_100 = arith.constant 0.000000e+00 : f32
    %99 = vector.broadcast %cst_100 : f32 to vector<4x32xf32>
    %100 = arith.maximumf %98, %99 : vector<4x32xf32>
    %101 = vector.extract_strided_slice %100 {offsets = [0, 0], sizes = [2, 32], strides = [1, 1]} : vector<4x32xf32> to vector<2x32xf32>
    %cst_101 = arith.constant dense<0.000000e+00> : vector<32xf32>
    %102 = vector.multi_reduction <add>, %101, %cst_101 [0] : vector<2x32xf32> to vector<32xf32>
    %103 = vector.shape_cast %102 : vector<32xf32> to vector<1x32xf32>
    %cst_102 = arith.constant 2.000000e+00 : f32
    %104 = vector.broadcast %cst_102 : f32 to vector<1x32xf32>
    %105 = arith.divf %103, %104 : vector<1x32xf32>
    %106 = vector.extract_strided_slice %100 {offsets = [2, 0], sizes = [2, 32], strides = [1, 1]} : vector<4x32xf32> to vector<2x32xf32>
    %cst_103 = arith.constant dense<0.000000e+00> : vector<32xf32>
    %107 = vector.multi_reduction <add>, %106, %cst_103 [0] : vector<2x32xf32> to vector<32xf32>
    %108 = vector.shape_cast %107 : vector<32xf32> to vector<1x32xf32>
    %cst_104 = arith.constant 2.000000e+00 : f32
    %109 = vector.broadcast %cst_104 : f32 to vector<1x32xf32>
    %110 = arith.divf %108, %109 : vector<1x32xf32>
    %111 = tpu.concatenate %105, %110 in 0 : vector<1x32xf32>, vector<1x32xf32> -> vector<2x32xf32>
    %c0_105 = arith.constant 0 : index
    %c0_106 = arith.constant 0 : index
    %112 = vector.load %arg17[%c0_105, %c0_106] : memref<32x1xf32, #tpu.memory_space<vmem>>, vector<32x1xf32>
    %cst_107 = arith.constant dense<0.000000e+00> : vector<2x1xf32>
    %113 = tpu.matmul %111, %112, %cst_107 {dimension_numbers = #tpu.dot_dimension_numbers<[1], [0], [0], [1], [0, 0, 1, 1], [], []>} : vector<2x32xf32>, vector<32x1xf32>, vector<2x1xf32> -> vector<2x1xf32>
    %c0_108 = arith.constant 0 : index
    %c0_109 = arith.constant 0 : index
    %114 = vector.load %arg18[%c0_108, %c0_109] : memref<1x1xf32, #tpu.memory_space<vmem>>, vector<1x1xf32>
    %115 = vector.broadcast %114 : vector<1x1xf32> to vector<2x1xf32>
    %116 = arith.addf %113, %115 : vector<2x1xf32>
    %117 = vector.extract_strided_slice %116 {offsets = [0, 0], sizes = [1, 1], strides = [1, 1]} : vector<2x1xf32> to vector<1x1xf32>
    %c0_110 = arith.constant 0 : index
    %c0_111 = arith.constant 0 : index
    %c0_112 = arith.constant 0 : index
    %118 = vector.load %arg19[%c0_110, %c0_111, %c0_112] : memref<2x1x1xf32, #tpu.memory_space<vmem>>, vector<1x1x1xf32>
    %119 = vector.shape_cast %118 : vector<1x1x1xf32> to vector<1x1xf32>
    %120 = vector.shape_cast %117 : vector<1x1xf32> to vector<1x1x1xf32>
    tpu.vector_store %arg19[%c0_110, %c0_111, %c0_112], %120 {strides = array<i32>} : memref<2x1x1xf32, #tpu.memory_space<vmem>>, vector<1x1x1xf32>,
    %121 = vector.extract_strided_slice %116 {offsets = [1, 0], sizes = [1, 1], strides = [1, 1]} : vector<2x1xf32> to vector<1x1xf32>
    %c1_113 = arith.constant 1 : index
    %c0_114 = arith.constant 0 : index
    %c0_115 = arith.constant 0 : index
    %122 = vector.load %arg19[%c1_113, %c0_114, %c0_115] : memref<2x1x1xf32, #tpu.memory_space<vmem>>, vector<1x1x1xf32>
    %123 = vector.shape_cast %122 : vector<1x1x1xf32> to vector<1x1xf32>
    %124 = vector.shape_cast %121 : vector<1x1xf32> to vector<1x1x1xf32>
    tpu.vector_store %arg19[%c1_113, %c0_114, %c0_115], %124 {strides = array<i32>} : memref<2x1x1xf32, #tpu.memory_space<vmem>>, vector<1x1x1xf32>,
    return
  }
  func.func @transform_0(%arg0: i32) -> (i32, i32, i32) {
    %c0_i32 = arith.constant 0 : i32
    %c0_i32_0 = arith.constant 0 : i32
    %c0_i32_1 = arith.constant 0 : i32
    return %arg0, %c0_i32, %c0_i32_0 : i32, i32, i32
  }
  func.func @transform_1(%arg0: i32) -> (i32, i32, i32) {
    %c0_i32 = arith.constant 0 : i32
    %c0_i32_0 = arith.constant 0 : i32
    %c0_i32_1 = arith.constant 0 : i32
    %c0_i32_2 = arith.constant 0 : i32
    return %c0_i32, %c0_i32_0, %c0_i32_1 : i32, i32, i32
  }
  func.func @transform_2(%arg0: i32) -> (i32, i32, i32) {
    %c0_i32 = arith.constant 0 : i32
    %c0_i32_0 = arith.constant 0 : i32
    %c0_i32_1 = arith.constant 0 : i32
    %c0_i32_2 = arith.constant 0 : i32
    return %c0_i32, %c0_i32_0, %c0_i32_1 : i32, i32, i32
  }
  func.func @transform_3(%arg0: i32) -> (i32, i32) {
    %c0_i32 = arith.constant 0 : i32
    %c0_i32_0 = arith.constant 0 : i32
    %c0_i32_1 = arith.constant 0 : i32
    return %c0_i32, %c0_i32_0 : i32, i32
  }
  func.func @transform_4(%arg0: i32) -> (i32, i32, i32) {
    %c0_i32 = arith.constant 0 : i32
    %c0_i32_0 = arith.constant 0 : i32
    %c0_i32_1 = arith.constant 0 : i32
    %c0_i32_2 = arith.constant 0 : i32
    return %c0_i32, %c0_i32_0, %c0_i32_1 : i32, i32, i32
  }
  func.func @transform_5(%arg0: i32) -> (i32, i32, i32) {
    %c0_i32 = arith.constant 0 : i32
    %c0_i32_0 = arith.constant 0 : i32
    %c0_i32_1 = arith.constant 0 : i32
    %c0_i32_2 = arith.constant 0 : i32
    return %c0_i32, %c0_i32_0, %c0_i32_1 : i32, i32, i32
  }
  func.func @transform_6(%arg0: i32) -> (i32, i32) {
    %c0_i32 = arith.constant 0 : i32
    %c0_i32_0 = arith.constant 0 : i32
    %c0_i32_1 = arith.constant 0 : i32
    return %c0_i32, %c0_i32_0 : i32, i32
  }
  func.func @transform_7(%arg0: i32) -> (i32, i32, i32) {
    %c0_i32 = arith.constant 0 : i32
    %c0_i32_0 = arith.constant 0 : i32
    %c0_i32_1 = arith.constant 0 : i32
    %c0_i32_2 = arith.constant 0 : i32
    return %c0_i32, %c0_i32_0, %c0_i32_1 : i32, i32, i32
  }
  func.func @transform_8(%arg0: i32) -> (i32, i32, i32) {
    %c0_i32 = arith.constant 0 : i32
    %c0_i32_0 = arith.constant 0 : i32
    %c0_i32_1 = arith.constant 0 : i32
    %c0_i32_2 = arith.constant 0 : i32
    return %c0_i32, %c0_i32_0, %c0_i32_1 : i32, i32, i32
  }
  func.func @transform_9(%arg0: i32) -> (i32, i32) {
    %c0_i32 = arith.constant 0 : i32
    %c0_i32_0 = arith.constant 0 : i32
    %c0_i32_1 = arith.constant 0 : i32
    return %c0_i32, %c0_i32_0 : i32, i32
  }
  func.func @transform_10(%arg0: i32) -> (i32, i32) {
    %c0_i32 = arith.constant 0 : i32
    %c0_i32_0 = arith.constant 0 : i32
    %c0_i32_1 = arith.constant 0 : i32
    return %c0_i32, %c0_i32_0 : i32, i32
  }
  func.func @transform_11(%arg0: i32) -> (i32, i32) {
    %c0_i32 = arith.constant 0 : i32
    %c0_i32_0 = arith.constant 0 : i32
    %c0_i32_1 = arith.constant 0 : i32
    return %c0_i32, %c0_i32_0 : i32, i32
  }
  func.func @transform_12(%arg0: i32) -> (i32, i32) {
    %c0_i32 = arith.constant 0 : i32
    %c0_i32_0 = arith.constant 0 : i32
    %c0_i32_1 = arith.constant 0 : i32
    return %c0_i32, %c0_i32_0 : i32, i32
  }
  func.func @transform_13(%arg0: i32) -> (i32, i32) {
    %c0_i32 = arith.constant 0 : i32
    %c0_i32_0 = arith.constant 0 : i32
    %c0_i32_1 = arith.constant 0 : i32
    return %c0_i32, %c0_i32_0 : i32, i32
  }
  func.func @transform_14(%arg0: i32) -> (i32, i32) {
    %c0_i32 = arith.constant 0 : i32
    %c0_i32_0 = arith.constant 0 : i32
    %c0_i32_1 = arith.constant 0 : i32
    return %c0_i32, %c0_i32_0 : i32, i32
  }
  func.func @transform_15(%arg0: i32) -> (i32, i32) {
    %c0_i32 = arith.constant 0 : i32
    %c0_i32_0 = arith.constant 0 : i32
    %c0_i32_1 = arith.constant 0 : i32
    return %c0_i32, %c0_i32_0 : i32, i32
  }
  func.func @transform_16(%arg0: i32) -> (i32, i32) {
    %c0_i32 = arith.constant 0 : i32
    %c0_i32_0 = arith.constant 0 : i32
    %c0_i32_1 = arith.constant 0 : i32
    return %c0_i32, %c0_i32_0 : i32, i32
  }
  func.func @transform_17(%arg0: i32) -> (i32, i32) {
    %c0_i32 = arith.constant 0 : i32
    %c0_i32_0 = arith.constant 0 : i32
    %c0_i32_1 = arith.constant 0 : i32
    return %c0_i32, %c0_i32_0 : i32, i32
  }
  func.func @transform_18(%arg0: i32) -> (i32, i32, i32) {
    %c0_i32 = arith.constant 0 : i32
    %c0_i32_0 = arith.constant 0 : i32
    %c0_i32_1 = arith.constant 0 : i32
    return %arg0, %c0_i32, %c0_i32_0 : i32, i32, i32
  }
}

</mosaic_0001>

<bundles_post_ra>
// kernel: discriminator_forward.1
= control target key start
LH: loop header
LB: loop body
LE: loop exit
PB: predicated region body
PF: predicated region fallthrough
CT: control target
= control target key end

     0   :  { %s3412_s0 = inlined_call_operand.vmem [shape: f32[2,16,28], index: 0, kind: input, shape index: {}]   ;;  %s3413_s1 = inlined_call_operand.hbm [shape: f32[3,16,32], index: 1, kind: input, shape index: {}]   ;;  %s3414_s2 = inlined_call_operand.hbm [shape: f32[3,28,64], index: 2, kind: input, shape index: {}]   ;;  %s3415_s3 = inlined_call_operand.hbm [shape: f32[1,64], index: 3, kind: input, shape index: {}]   ;;  %s3416_s4 = inlined_call_operand.hbm [shape: f32[3,8,16], index: 4, kind: input, shape index: {}]   ;;  %s3417_s5 = inlined_call_operand.vmem [shape: f32[3,64,128], index: 5, kind: input, shape index: {}]   ;;  %s3418_s6 = inlined_call_operand.hbm [shape: f32[1,128], index: 6, kind: input, shape index: {}]   ;;  %s3419_s7 = inlined_call_operand.hbm [shape: f32[3,4,8], index: 7, kind: input, shape index: {}]   ;;  %s3420_s8 = inlined_call_operand.hbm [shape: f32[3,128,256], index: 8, kind: input, shape index: {}]   ;;  %s3421_s9 = inlined_call_operand.hbm [shape: f32[1,256], index: 9, kind: input, shape index: {}]   ;;  %s3422_s10 = inlined_call_operand.vmem [shape: f32[256,128], index: 10, kind: input, shape index: {}]   ;;  %s3423_s11 = inlined_call_operand.hbm [shape: f32[1,128], index: 11, kind: input, shape index: {}]   ;;  %s3424_s12 = inlined_call_operand.vmem [shape: f32[128,64], index: 12, kind: input, shape index: {}]   ;;  %s3425_s13 = inlined_call_operand.hbm [shape: f32[1,64], index: 13, kind: input, shape index: {}]   ;;  %s3426_s14 = inlined_call_operand.vmem [shape: f32[64,32], index: 14, kind: input, shape index: {}]   ;;  %s3427_s15 = inlined_call_operand.vmem [shape: f32[1,32], index: 15, kind: input, shape index: {}]   ;;  %s3428_s16 = inlined_call_operand.vmem [shape: f32[32,1], index: 16, kind: input, shape index: {}]   ;;  %s3429_s17 = inlined_call_operand.<no memory space> [shape: f32[1,1], index: 17, kind: input, shape index: {}]   ;;  %s3430_s18 = inlined_call_operand.vmem [shape: f32[2,1,1], index: 18, kind: output, shape index: {}]  }
   0x1   :  { %3432 = sst [smem:[#allocation25_spill]] %s3412_s0  ;;  %v23_v0 = vstv %s3429_s17 }
   0x2   :  { %3433 = sst [smem:[#allocation26_spill]] %s3413_s1  ;;  %24 = vst [vmem:[#allocation2] sm:$0x1] %v23_v0 }
   0x3   :  { %3434 = sst [smem:[#allocation27_spill]] %s3414_s2 }
   0x4   :  { %25 = vsyncpa [#allocation4], 0 }
   0x5   :  { %26 = vsyncpa [#allocation6], 0 }
   0x6   :  { %27 = vsyncpa [#allocation9], 0 }
   0x7   :  { %28 = vsyncpa [#allocation12], 0 }
   0x8   :  { %29 = vsyncpa [#allocation15], 0 }
   0x9   :  { %30 = vsyncpa [#allocation18], 0  ;;  %s2824_s29 = smov [#allocation5]   ;;  %s2825_s0 = smov [#allocation8]  }
   0xa   :  { %s50_s30 = sshll.u32 %s2824_s29, 4  ;;  %s72_s19 = sshll.u32 %s2825_s0, 4  ;;  %s51_s30 = int_to_ptr.vmem [resolvable:$true] %s50_s30  ;;  %s73_s19 = int_to_ptr.vmem [resolvable:$true] %s72_s19 }
   0xb   :  { %s2620_s1 = scalar_lea.vmem %s51_s30, 1536  ;;  %p2625_p1 = scmp.lt.s32.totalorder %s51_s30, %s51_s30 }
   0xc   :  { %p2621_p0 = scmp.ne.s32.totalorder %s51_s30, %s2620_s1  ;;  %p2626_p2 = scmp.lt.s32.totalorder %s2620_s1, %s2620_s1 }
   0xe   :  { %p2627_p3 = por %p2626_p2, %p2625_p1 }
  0x10   :  { %p2628_p4 = pnand %p2627_p3, %p2621_p0 }
  0x12   :  { %2631 = shalt.err (!%p2628_p4)
}
  0x13   :  { %s2826_s17 = smov 128   ;;  %s2827_s20 = smov 8  }
  0x14   :  { %s3435_s2 = sld [smem:[#allocation27_spill]]  ;;  %s2640_s23 = scalar_lea.vmem %s73_s19, 384 }
  0x15   :  { %p2641_p5 = scmp.ne.s32.totalorder %s73_s19, %s2640_s23  ;;  %p2645_p6 = scmp.lt.s32.totalorder %s73_s19, %s73_s19 }
  0x16   :  { %p2646_p7 = scmp.lt.s32.totalorder %s2640_s23, %s2640_s23 }
  0x18   :  { %p2647_p8 = por %p2646_p7, %p2645_p6 }
  0x1a   :  { %56 = dma.hbm_to_vmem [thread:$0]  %s3435_s2, 1536, %s51_s30, [#allocation6], %s2826_s17, %s2826_s17, %s2827_s20  }
  0x1b   :  { %p2648_p9 = pnand %p2647_p8, %p2641_p5 }
  0x1d   :  { %2651 = shalt.err (!%p2648_p9)
}
  0x1e   :  { %78 = dma.hbm_to_vmem [thread:$0]  %s3416_s4, 384, %s73_s19, [#allocation9], %s2826_s17, %s2826_s17, %s2827_s20  }
  0x1f   :  { %s2828_s26 = smov [#allocation11]  }
  0x20   :  { %s96_s27 = sshll.u32 %s2828_s26, 4  ;;  %s97_s27 = int_to_ptr.vmem [resolvable:$true] %s96_s27 }
  0x21   :  { %s2660_s28 = scalar_lea.vmem %s97_s27, 192  ;;  %p2665_p11 = scmp.lt.s32.totalorder %s97_s27, %s97_s27 }
  0x22   :  { %p2661_p10 = scmp.ne.s32.totalorder %s97_s27, %s2660_s28  ;;  %p2666_p12 = scmp.lt.s32.totalorder %s2660_s28, %s2660_s28 }
  0x24   :  { %p2667_p13 = por %p2666_p12, %p2665_p11 }
  0x26   :  { %p2668_p0 = pnand %p2667_p13, %p2661_p10 }
  0x28   :  { %2671 = shalt.err (!%p2668_p0)
}
  0x29   :  { %s2829_s29 = smov 64   ;;  %s2830_s30 = smov 4  }
  0x2a   :  { %102 = dma.hbm_to_vmem [thread:$0]  %s3419_s7, 192, %s97_s27, [#allocation12], %s2829_s29, %s2829_s29, %s2830_s30  }
  0x2b   :  { %s2831_s21 = smov [#allocation14]   ;;  %s2832_s4 = smov [#allocation3]  }
  0x2c   :  { %s121_s22 = sshll.u32 %s2831_s21, 4  ;;  %s38_s19 = sshll.u32 %s2832_s4, 4  ;;  %s122_s22 = int_to_ptr.vmem [resolvable:$true] %s121_s22  ;;  %s39_s19 = int_to_ptr.vmem [resolvable:$true] %s38_s19 }
  0x2d   :  { %s2680_s2 = scalar_lea.vmem %s122_s22, 32  ;;  %p2685_p2 = scmp.lt.s32.totalorder %s122_s22, %s122_s22 }
  0x2e   :  { %p2681_p1 = scmp.ne.s32.totalorder %s122_s22, %s2680_s2  ;;  %p2686_p3 = scmp.lt.s32.totalorder %s2680_s2, %s2680_s2 }
  0x30   :  { %p2687_p4 = por %p2686_p3, %p2685_p2 }
  0x32   :  { %p2688_p5 = pnand %p2687_p4, %p2681_p1 }
  0x34   :  { %2691 = shalt.err (!%p2688_p5)
}
  0x35   :  { %124 = dma.hbm_to_vmem [thread:$0]  %s3421_s9, 32, %s122_s22, [#allocation15]  }
  0x36   :  { %s2700_s25 = scalar_lea.vmem %s39_s19, 768  ;;  %p2705_p7 = scmp.lt.s32.totalorder %s39_s19, %s39_s19 }
  0x37   :  { %p2701_p6 = scmp.ne.s32.totalorder %s39_s19, %s2700_s25  ;;  %p2706_p8 = scmp.lt.s32.totalorder %s2700_s25, %s2700_s25 }
  0x39   :  { %p2707_p9 = por %p2706_p8, %p2705_p7 }
  0x3b   :  { %p2708_p10 = pnand %p2707_p9, %p2701_p6 }
  0x3d   :  { %2711 = shalt.err (!%p2708_p10)
}
  0x3e   :  { %s3436_s27 = sld [smem:[#allocation26_spill]]  ;;  %s2833_s28 = smov [#allocation7]  }
  0x3f   :  { %s63_s29 = sshll.u32 %s2833_s28, 4  ;;  %s2834_s30 = smov [#allocation10]   ;;  %s64_s29 = int_to_ptr.vmem [resolvable:$true] %s63_s29 }
  0x40   :  { %s87_s9 = sshll.u32 %s2834_s30, 4  ;;  %s2720_s0 = scalar_lea.vmem %s64_s29, 16  ;;  %s88_s9 = int_to_ptr.vmem [resolvable:$true] %s87_s9 }
  0x41   :  { %p2721_p11 = scmp.ne.s32.totalorder %s64_s29, %s2720_s0  ;;  %s2724_s1 = scalar_lea.vmem %s64_s29, 32 }
  0x42   :  { %p2725_p12 = scmp.lt.s32.totalorder %s64_s29, %s64_s29  ;;  %p2726_p13 = scmp.lt.s32.totalorder %s2724_s1, %s2720_s0 }
  0x44   :  { %44 = dma.hbm_to_vmem [thread:$0]  %s3436_s27, 768, %s39_s19, [#allocation4], %s2826_s17, %s2826_s17, %s2827_s20  }
  0x45   :  { %p2727_p0 = por %p2726_p13, %p2725_p12 }
  0x47   :  { %p2728_p1 = pnand %p2727_p0, %p2721_p11 }
  0x49   :  { %2731 = shalt.err (!%p2728_p1)
}
  0x4a   :  { %66 = dma.hbm_to_vmem [thread:$0]  %s3415_s3, 16, %s64_s29, [#allocation6]  }
  0x4b   :  { %s2740_s4 = scalar_lea.vmem %s88_s9, 16  ;;  %s2744_s17 = scalar_lea.vmem %s88_s9, 32 }
  0x4c   :  { %p2741_p2 = scmp.ne.s32.totalorder %s88_s9, %s2740_s4  ;;  %p2745_p3 = scmp.lt.s32.totalorder %s88_s9, %s88_s9 }
  0x4d   :  { %p2746_p4 = scmp.lt.s32.totalorder %s2744_s17, %s2740_s4 }
  0x4f   :  { %p2747_p5 = por %p2746_p4, %p2745_p3 }
  0x51   :  { %p2748_p6 = pnand %p2747_p5, %p2741_p2 }
  0x53   :  { %2751 = shalt.err (!%p2748_p6)
}
  0x54   :  { %90 = dma.hbm_to_vmem [thread:$0]  %s3418_s6, 16, %s88_s9, [#allocation9]  }
  0x55   :  { %s2835_s2 = smov [#allocation13]  }
  0x56   :  { %s108_s23 = sshll.u32 %s2835_s2, 4  ;;  %s109_s23 = int_to_ptr.vmem [resolvable:$true] %s108_s23 }
  0x57   :  { %s2760_s24 = scalar_lea.vmem %s109_s23, 12288  ;;  %p2765_p8 = scmp.lt.s32.totalorder %s109_s23, %s109_s23 }
  0x58   :  { %p2761_p7 = scmp.ne.s32.totalorder %s109_s23, %s2760_s24  ;;  %p2766_p9 = scmp.lt.s32.totalorder %s2760_s24, %s2760_s24 }
  0x5a   :  { %p2767_p10 = por %p2766_p9, %p2765_p8 }
  0x5c   :  { %p2768_p11 = pnand %p2767_p10, %p2761_p7 }
  0x5e   :  { %2771 = shalt.err (!%p2768_p11)
}
  0x5f   :  { %s2836_s3 = smov 256   ;;  %s2837_s25 = smov 16  }
  0x60   :  { %114 = dma.hbm_to_vmem [thread:$0]  %s3420_s8, 12288, %s109_s23, [#allocation12], %s2836_s3, %s2836_s3, %s2837_s25  }
  0x61   :  { %s2838_s27 = smov [#allocation16]   ;;  %s2839_s29 = smov [#allocation17]  }
  0x62   :  { %s133_s28 = sshll.u32 %s2838_s27, 4  ;;  %s145_s6 = sshll.u32 %s2839_s29, 4  ;;  %s134_s28 = int_to_ptr.vmem [resolvable:$true] %s133_s28  ;;  %s146_s6 = int_to_ptr.vmem [resolvable:$true] %s145_s6 }
  0x63   :  { %s2780_s30 = scalar_lea.vmem %s134_s28, 16  ;;  %s2784_s9 = scalar_lea.vmem %s134_s28, 32 }
  0x64   :  { %p2781_p12 = scmp.ne.s32.totalorder %s134_s28, %s2780_s30  ;;  %p2785_p13 = scmp.lt.s32.totalorder %s134_s28, %s134_s28 }
  0x65   :  { %p2786_p0 = scmp.lt.s32.totalorder %s2784_s9, %s2780_s30 }
  0x67   :  { %p2787_p1 = por %p2786_p0, %p2785_p13 }
  0x69   :  { %p2788_p2 = pnand %p2787_p1, %p2781_p12 }
  0x6b   :  { %2791 = shalt.err (!%p2788_p2)
}
  0x6c   :  { %136 = dma.hbm_to_vmem [thread:$0]  %s3423_s11, 16, %s134_s28, [#allocation15]  }
  0x6d   :  { %s2800_s21 = scalar_lea.vmem %s146_s6, 16  ;;  %s2804_s8 = scalar_lea.vmem %s146_s6, 32 }
  0x6e   :  { %p2801_p3 = scmp.ne.s32.totalorder %s146_s6, %s2800_s21  ;;  %p2805_p4 = scmp.lt.s32.totalorder %s146_s6, %s146_s6 }
  0x6f   :  { %p2806_p5 = scmp.lt.s32.totalorder %s2804_s8, %s2800_s21 }
  0x71   :  { %p2807_p6 = por %p2806_p5, %p2805_p4 }
  0x73   :  { %p2808_p7 = pnand %p2807_p6, %p2801_p3 }
  0x75   :  { %2811 = shalt.err (!%p2808_p7)
}
  0x76   :  { %148 = dma.hbm_to_vmem [thread:$0]  %s3425_s13, 16, %s146_s6, [#allocation18]  }
  0x77   :  { %2812 = dma.done.wait [#allocation4], 768  }
  0x78   :  { %2813 = vsyncadd [#allocation4], 4294966528 }
  0x79   :  { %2814 = dma.done.wait [#allocation6], 1552  }
  0x7a   :  { %2815 = vsyncadd [#allocation6], 4294965744 }
  0x7b   :  { %2816 = dma.done.wait [#allocation9], 400  }
  0x7c   :  { %2817 = vsyncadd [#allocation9], 4294966896 }
  0x7d   :  { %2818 = dma.done.wait [#allocation12], 12480  }
  0x7e   :  { %2819 = vsyncadd [#allocation12], 4294954816 }
  0x7f   :  { %2820 = dma.done.wait [#allocation15], 48  }
  0x80   :  { %2821 = vsyncadd [#allocation15], 4294967248 }
  0x81   :  { %2822 = dma.done.wait [#allocation18], 16  }
  0x82   :  { %2823 = vsyncadd [#allocation18], 4294967280  ;;  %s3437_s20 = sld [smem:[#allocation25_spill]]  ;;  %v192_v5 = vld [vmem:[#allocation3] sm:$0xff]  ;;  %vm194_vm0 = vcmask 261120   ;;  %v281_v6 = vld [vmem:[#allocation3 + $0x10] sm:$0xff] }
  0x83   :  { %v193_v7 = vld [vmem:[#allocation3 + $0x8] sm:$0xff]  ;;  %v282_v8 = vld [vmem:[#allocation3 + $0x18] sm:$0xff]  ;;  %2378 = vmatprep.mubr.msk.f32.mxu0 %vm194_vm0, %v192_v5  ;;  %vm376_vm1 = vcmask 1043456   ;;  %2389 = vmatprep.mubr.msk.f32.mxu1 %vm194_vm0, %v281_v6  ;;  %v367_v11 = vld [vmem:[#allocation5 + $0x30] sm:$0xff]  ;;  %vm369_vm2 = vcmask 228352   ;;  %v2840_v31 = vmov 0.0  }
  0x84   :  { %v368_v9 = vld [vmem:[#allocation5 + $0x38] sm:$0xf]  ;;  %v278_v12 = vld [vmem:[#allocation5 + $0x10] sm:$0xff]  ;;  %v366_v13 = vld [vmem:[#allocation5 + $0x28] sm:$0xff]  ;;  %vm2841_vm3 = vmmov 0   ;;  %vm726_vm4 = vcmask 130048  }
  0x85   :  { %v279_v10 = vld [vmem:[#allocation5 + $0x18] sm:$0xf]  ;;  %v277_v14 = vld [vmem:[#allocation5 + $0x8] sm:$0xff]  ;;  %v365_v15 = vld [vmem:[#allocation5 + $0x20] sm:$0xff]  ;;  %vm892_vm5 = vcmask 523264   ;;  %vm1207_vm6 = vcmask 64512  }
  0x86   :  { %v276_v16 = vld [vmem:[#allocation5] sm:$0xff]  ;;  %v540_v21 = vld [vmem:[#allocation3 + $0x20] sm:$0xff]  ;;  %v541_v22 = vld [vmem:[#allocation3 + $0x28] sm:$0xff]  ;;  %vm2053_vm7 = vcmask 254976   ;;  %vm2074_vm8 = vcmask 1040384   ;;  %vm2160_vm9 = vcmask 0  }
  0x87   :  { %v627_v23 = vld [vmem:[#allocation5 + $0x58] sm:$0xf]  ;;  %v626_v24 = vld [vmem:[#allocation5 + $0x50] sm:$0xff]  ;;  %v625_v25 = vld [vmem:[#allocation5 + $0x48] sm:$0xff]  ;;  %vm2163_vm10 = vcmask 1025  }
  0x88   :  { %v2982_v1 = vld [vmem:[%s3437_s20 + $0x18] sm:$0xff]  ;;  %v2987_v2 = vld [vmem:[%s3437_s20 + $0x10] sm:$0xff]  ;;  %v2996_v3 = vld [vmem:[%s3437_s20 + $0x8] sm:$0xff] }
  0x89   :  { %2370 = vmatprep.subr.mxu0 %v2982_v1  ;;  %2381 = vmatprep.subr.mxu1 %v2982_v1  ;;  %v187_v4 = vld [vmem:[%s3437_s20] sm:$0xff]  ;;  %v624_v26 = vld [vmem:[#allocation5 + $0x40] sm:$0xff]  ;;  %v2200_v34 = vld [vmem:[%s3417_s5 + $0x68] sm:$0xff] }
  0x8a   :  { %2371 = vmatpush3.msra.mxu0 %v2982_v1  ;;  %2382 = vmatpush3.msra.mxu1 %v2982_v1  ;;  %v2202_v32 = vld [vmem:[%s3417_s5 + $0x78] sm:$0xff]  ;;  %v2201_v33 = vld [vmem:[%s3417_s5 + $0x70] sm:$0xff]  ;;  %v2199_v35 = vld [vmem:[%s3417_s5 + $0x60] sm:$0xff] }
  0x8b   :  { %2372 = vmatprep.subr.mxu0 %v2987_v2  ;;  %2383 = vmatprep.subr.mxu1 %v2987_v2  ;;  %v2198_v36 = vld [vmem:[%s3417_s5 + $0x58] sm:$0xff]  ;;  %v2197_v37 = vld [vmem:[%s3417_s5 + $0x50] sm:$0xff]  ;;  %v805_v55 = vld [vmem:[%s3417_s5 + $0x28] sm:$0xff] }
  0x8c   :  { %2373 = vmatpush3.msra.mxu0 %v2987_v2  ;;  %2384 = vmatpush3.msra.mxu1 %v2987_v2  ;;  %v2192_v42 = vld [vmem:[#allocation7] ss:$0 sm:$0xff]  ;;  %v725_v51 = vld [vmem:[#allocation8] sm:$0xff]  ;;  %v809_v52 = vld [vmem:[#allocation8 + $0x8] sm:$0xff] }
  0x8d   :  { %2374 = vmatprep.subr.mxu0 %v2996_v3  ;;  %2385 = vmatprep.subr.mxu1 %v2996_v3  ;;  %v807_v53 = vld [vmem:[%s3417_s5 + $0x38] sm:$0xff]  ;;  %v806_v54 = vld [vmem:[%s3417_s5 + $0x30] sm:$0xff]  ;;  %v804_v56 = vld [vmem:[%s3417_s5 + $0x20] sm:$0xff] }
  0x8e   :  { %2375 = vmatpush3.msra.mxu0 %v2996_v3  ;;  %2386 = vmatpush3.msra.mxu1 %v2996_v3  ;;  %v803_v57 = vld [vmem:[%s3417_s5 + $0x18] sm:$0xff]  ;;  %v802_v58 = vld [vmem:[%s3417_s5 + $0x10] sm:$0xff]  ;;  %v801_v59 = vld [vmem:[%s3417_s5 + $0x8] sm:$0xff] }
  0x8f   :  { %2376 = vmatprep.subr.mxu0 %v187_v4  ;;  %2387 = vmatprep.subr.mxu1 %v187_v4  ;;  %v800_v60 = vld [vmem:[%s3417_s5] sm:$0xff]  ;;  %v2196_v61 = vld [vmem:[%s3417_s5 + $0x48] sm:$0xff]  ;;  %v2213_v63 = vld [vmem:[%s3417_s5 + $0xb8] sm:$0xff] }
  0x90   :  { %2377 = vmatpush3.msra.mxu0 %v187_v4  ;;  %2388 = vmatpush3.msra.mxu1 %v187_v4  ;;  %v2195_v62 = vld [vmem:[%s3417_s5 + $0x40] sm:$0xff] }
  0x91   :  { %2379 = vmatmul.mubr.msk.f32.vlgmr.msra.gmra.mxu0 %vm194_vm0, %v193_v7  ;;  %2390 = vmatmul.mubr.msk.f32.vlgmr.msra.gmra.mxu1 %vm194_vm0, %v282_v8  ;;  %v1040_v6 = vld [vmem:[#allocation8 + $0x10] sm:$0xff]  ;;  %v2209_v8 = vld [vmem:[%s3417_s5 + $0x98] sm:$0xff] }
  0x92   :  { %2392 = vmatprep.subr.msk.mxu0 %vm376_vm1, %v368_v9  ;;  %2403 = vmatprep.subr.msk.mxu1 %vm376_vm1, %v279_v10  ;;  %v2210_v7 = vld [vmem:[%s3417_s5 + $0xa0] sm:$0xff] }
  0x93   :  { %2393 = vmatpush3.msk.msra.mxu0 %vm376_vm1, %v368_v9  ;;  %2404 = vmatpush3.msk.msra.mxu1 %vm376_vm1, %v279_v10  ;;  %v2208_v9 = vld [vmem:[%s3417_s5 + $0x90] sm:$0xff]  ;;  %v2207_v10 = vld [vmem:[%s3417_s5 + $0x88] sm:$0xff] }
  0x94   :  { %2394 = vmatprep.subr.mxu0 %v367_v11  ;;  %2405 = vmatprep.subr.mxu1 %v278_v12 }
  0x95   :  { %2395 = vmatpush3.msra.mxu0 %v367_v11  ;;  %2406 = vmatpush3.msra.mxu1 %v278_v12  ;;  %v2206_v11 = vld [vmem:[%s3417_s5 + $0x80] sm:$0xff] }
  0x96   :  { %2396 = vmatprep.subr.mxu0 %v366_v13  ;;  %2407 = vmatprep.subr.mxu1 %v277_v14 }
  0x97   :  { %2397 = vmatpush3.msra.mxu0 %v366_v13  ;;  %2408 = vmatpush3.msra.mxu1 %v277_v14 }
  0x98   :  { %2398 = vmatprep.subr.mxu0 %v365_v15  ;;  %2409 = vmatprep.subr.mxu1 %v276_v16 }
  0x99   :  { %2399 = vmatpush3.msra.mxu0 %v365_v15  ;;  %2410 = vmatpush3.msra.mxu1 %v276_v16 }
  0x9a   :  { %2414 = vmatprep.subr.mxu0 %v2982_v1  ;;  %2425 = vmatprep.subr.msk.mxu1 %vm376_vm1, %v627_v23 }
 0x151   :  { %v2380_v17 = vpop.f32.mrf.mxu0  ;;  %v2391_v18 = vpop.f32.mrf.mxu1 }
 0x153   :  { %v267_v19 = vpop.f32.mrf.mxu0  ;;  %v355_v20 = vpop.f32.mrf.mxu1 }
 0x154   :  { %2400 = vmatprep.mubr.msk.f32.mxu0 %vm369_vm2, %v355_v20  ;;  %2411 = vmatprep.mubr.msk.f32.mxu1 %vm369_vm2, %v267_v19  ;;  %v1312_v19 = vld [vmem:[#allocation13 + $0xf8] sm:$0xff]  ;;  %v1311_v20 = vld [vmem:[#allocation13 + $0xf0] sm:$0xff] }
 0x155   :  { %2401 = vmatmul.mubr.msk.f32.vlgmr.msra.gmra.mxu0 %vm369_vm2, %v2391_v18  ;;  %2412 = vmatmul.mubr.msk.f32.vlgmr.msra.gmra.mxu1 %vm369_vm2, %v2380_v17 }
 0x156   :  { %2415 = vmatpush3.msra.mxu0 %v2982_v1  ;;  %2422 = vmatprep.mubr.msk.f32.mxu0 %vm194_vm0, %v540_v21  ;;  %v2212_v1 = vld [vmem:[%s3417_s5 + $0xb0] sm:$0xff]  ;;  %v1310_v21 = vld [vmem:[#allocation13 + $0xe8] sm:$0xff] }
 0x157   :  { %2416 = vmatprep.subr.mxu0 %v2987_v2  ;;  %2426 = vmatpush3.msk.msra.mxu1 %vm376_vm1, %v627_v23  ;;  %v1308_v23 = vld [vmem:[#allocation13 + $0xd8] sm:$0xff] }
 0x158   :  { %2417 = vmatpush3.msra.mxu0 %v2987_v2  ;;  %2427 = vmatprep.subr.mxu1 %v626_v24 }
 0x159   :  { %2418 = vmatprep.subr.mxu0 %v2996_v3  ;;  %2428 = vmatpush3.msra.mxu1 %v626_v24  ;;  %v1307_v24 = vld [vmem:[#allocation13 + $0xd0] sm:$0xff] }
 0x15a   :  { %2419 = vmatpush3.msra.mxu0 %v2996_v3  ;;  %2429 = vmatprep.subr.mxu1 %v625_v25 }
 0x15b   :  { %2420 = vmatprep.subr.mxu0 %v187_v4  ;;  %2430 = vmatpush3.msra.mxu1 %v625_v25  ;;  %v1306_v25 = vld [vmem:[#allocation13 + $0xc8] sm:$0xff] }
 0x15c   :  { %2421 = vmatpush3.msra.mxu0 %v187_v4  ;;  %2431 = vmatprep.subr.mxu1 %v624_v26  ;;  %v2211_v4 = vld [vmem:[%s3417_s5 + $0xa8] sm:$0xff] }
 0x15d   :  { %2423 = vmatmul.mubr.msk.f32.vlgmr.msra.gmra.mxu0 %vm194_vm0, %v541_v22  ;;  %2432 = vmatpush3.msra.mxu1 %v624_v26  ;;  %v1309_v22 = vld [vmem:[#allocation13 + $0xe0] sm:$0xff] }
 0x15e   :  { %2436 = vmatprep.subr.mxu1 %v2840_v31  ;;  %2450 = vmatprep.subr.mxu0 %v2840_v31  ;;  %v1305_v26 = vld [vmem:[#allocation13 + $0xc0] sm:$0xff] }
 0x15f   :  { %2466 = vmatprep.mubr.msk.f32.mxu0 %vm2841_vm3, %v2840_v31  ;;  %2451 = vmatpush3.msra.mxu0 %v2202_v32  ;;  %v1300_v32 = vld [vmem:[#allocation13 + $0x98] sm:$0xff] }
 0x160   :  { %2452 = vmatprep.subr.mxu0 %v2840_v31 }
 0x161   :  { %2453 = vmatpush3.msra.mxu0 %v2201_v33  ;;  %v1299_v33 = vld [vmem:[#allocation13 + $0x90] sm:$0xff] }
 0x162   :  { %2454 = vmatprep.subr.mxu0 %v2840_v31 }
 0x163   :  { %2455 = vmatpush3.msra.mxu0 %v2200_v34  ;;  %v1298_v34 = vld [vmem:[#allocation13 + $0x88] sm:$0xff] }
 0x164   :  { %2456 = vmatprep.subr.mxu0 %v2840_v31 }
 0x165   :  { %2457 = vmatpush3.msra.mxu0 %v2199_v35  ;;  %v1297_v35 = vld [vmem:[#allocation13 + $0x80] sm:$0xff] }
 0x166   :  { %2458 = vmatprep.subr.mxu0 %v2840_v31 }
 0x167   :  { %2459 = vmatpush3.msra.mxu0 %v2198_v36  ;;  %v1296_v36 = vld [vmem:[#allocation13 + $0x78] sm:$0xff] }
 0x168   :  { %2460 = vmatprep.subr.mxu0 %v2840_v31 }
 0x169   :  { %2461 = vmatpush3.msra.mxu0 %v2197_v37  ;;  %v1295_v37 = vld [vmem:[#allocation13 + $0x70] sm:$0xff] }
 0x16a   :  { %2462 = vmatprep.subr.mxu0 %v2840_v31 }
 0x16b   :  { %2463 = vmatpush3.msra.mxu0 %v2196_v61  ;;  %v1417_v61 = vld [vmem:[#allocation13 + $0x1e0] sm:$0xff] }
 0x16c   :  { %2464 = vmatprep.subr.mxu0 %v2840_v31 }
 0x16d   :  { %2465 = vmatpush3.msra.mxu0 %v2195_v62  ;;  %v1416_v62 = vld [vmem:[#allocation13 + $0x1d8] sm:$0xff] }
 0x16e   :  { %2488 = vmatprep.subr.mxu0 %v2840_v31 }
 0x215   :  { %v2402_v27 = vpop.f32.mrf.mxu0  ;;  %v2413_v38 = vpop.f32.mrf.mxu1 }
 0x216   :  { %v536_v40 = vadd.f32 %v2413_v38, %v2402_v27  ;;  %v1304_v27 = vld [vmem:[#allocation13 + $0xb8] sm:$0xff]  ;;  %v1294_v38 = vld [vmem:[#allocation13 + $0x68] sm:$0xff] }
 0x217   :  { %v446_v28 = vpop.f32.mrf.mxu0  ;;  %v530_v39 = vpop.f32.mrf.mxu1 }
 0x218   :  { %v531_v43 = vadd.f32 %v530_v39, %v446_v28  ;;  %v1303_v28 = vld [vmem:[#allocation13 + $0xb0] sm:$0xff]  ;;  %v1293_v39 = vld [vmem:[#allocation13 + $0x60] sm:$0xff] }
 0x21d   :  { %v2424_v29 = vpop.f32.mrf.mxu0 }
 0x21f   :  { %v614_v30 = vpop.f32.mrf.mxu0 }
 0x220   :  { %2433 = vmatprep.mubr.msk.f32.mxu1 %vm369_vm2, %v614_v30  ;;  %v1301_v30 = vld [vmem:[#allocation13 + $0xa0] sm:$0xff] }
 0x221   :  { %2434 = vmatmul.mubr.msk.f32.vlgmr.msra.gmra.mxu1 %vm369_vm2, %v2424_v29  ;;  %v1302_v29 = vld [vmem:[#allocation13 + $0xa8] sm:$0xff] }
 0x222   :  { %2440 = vmatprep.mubr.msk.f32.mxu1 %vm2841_vm3, %v2840_v31 }
 0x2e1   :  { %v2435_v41 = vpop.f32.mrf.mxu1 }
 0x2e2   :  { %v713_v44 = vadd.f32 %v2435_v41, %v536_v40  ;;  %v1292_v40 = vld [vmem:[#allocation13 + $0x58] sm:$0xff]  ;;  %v1291_v41 = vld [vmem:[#allocation13 + $0x50] sm:$0xff] }
 0x2e3   :  { %v703_v45 = vpop.f32.mrf.mxu1 }
 0x2e4   :  { %v722_v46 = vadd.f32 %v2192_v42, %v713_v44  ;;  %v712_v47 = vadd.f32 %v703_v45, %v531_v43  ;;  %v1289_v43 = vld [vmem:[#allocation13 + $0x40] sm:$0xff]  ;;  %v1288_v44 = vld [vmem:[#allocation13 + $0x38] sm:$0xff]  ;;  %v1287_v45 = vld [vmem:[#allocation13 + $0x30] sm:$0xff] }
 0x2e6   :  { %v724_v48 = vmax.f32 %v722_v46, 0.0  ;;  %v721_v49 = vadd.f32 %v2192_v42, %v712_v47  ;;  %v1290_v42 = vld [vmem:[#allocation13 + $0x48] sm:$0xff]  ;;  %v1285_v47 = vld [vmem:[#allocation13 + $0x20] sm:$0xff] }
 0x2e7   :  { %v1286_v46 = vld [vmem:[#allocation13 + $0x28] sm:$0xff] }
 0x2e8   :  { %v3063_v50 = vmax.f32 %v721_v49, 0.0  ;;  %2437 = vmatpush3.msra.mxu1 %v724_v48  ;;  %v1283_v49 = vld [vmem:[#allocation13 + $0x10] sm:$0xff] }
 0x2e9   :  { %2438 = vmatprep.subr.mxu1 %v2840_v31 }
 0x2ea   :  { %2439 = vmatpush3.msra.mxu1 %v3063_v50 }
 0x2eb   :  { %2441 = vmatmul.mubr.msk.f32.vlgmr.msra.gmra.mxu1 %vm726_vm4, %v725_v51  ;;  %2443 = vmatprep.subr.mxu1 %v2840_v31  ;;  %v2215_v51 = vld [vmem:[#allocation10] ss:$0 sm:$0xff] }
 0x2ec   :  { %2444 = vmatpush3.msra.mxu1 %v724_v48  ;;  %2447 = vmatprep.mubr.msk.f32.mxu1 %vm2841_vm3, %v2840_v31 }
 0x2ed   :  { %2445 = vmatprep.subr.mxu1 %v2840_v31 }
 0x2ee   :  { %2446 = vmatpush3.msra.mxu1 %v3063_v50 }
 0x2ef   :  { %2448 = vmatmul.mubr.msk.f32.vlgmr.msra.gmra.mxu1 %vm726_vm4, %v809_v52  ;;  %2469 = vmatprep.subr.mxu1 %v2840_v31 }
 0x2f0   :  { %2470 = vmatpush3.msra.mxu1 %v807_v53  ;;  %2485 = vmatprep.mubr.msk.f32.mxu1 %vm2841_vm3, %v2840_v31 }
 0x2f1   :  { %2471 = vmatprep.subr.mxu1 %v2840_v31 }
 0x2f2   :  { %2472 = vmatpush3.msra.mxu1 %v806_v54 }
 0x2f3   :  { %2473 = vmatprep.subr.mxu1 %v2840_v31 }
 0x2f4   :  { %2474 = vmatpush3.msra.mxu1 %v805_v55 }
 0x2f5   :  { %2475 = vmatprep.subr.mxu1 %v2840_v31 }
 0x2f6   :  { %2476 = vmatpush3.msra.mxu1 %v804_v56  ;;  %v1206_v56 = vld [vmem:[#allocation11] sm:$0xf] }
 0x2f7   :  { %2477 = vmatprep.subr.mxu1 %v2840_v31 }
 0x2f8   :  { %2478 = vmatpush3.msra.mxu1 %v803_v57  ;;  %v1420_v57 = vld [vmem:[#allocation13 + $0x1f8] sm:$0xff] }
 0x2f9   :  { %2479 = vmatprep.subr.mxu1 %v2840_v31 }
 0x2fa   :  { %2480 = vmatpush3.msra.mxu1 %v802_v58  ;;  %v1314_v58 = vld [vmem:[#allocation11 + $0x4] sm:$0xf] }
 0x2fb   :  { %2481 = vmatprep.subr.mxu1 %v2840_v31 }
 0x2fc   :  { %2482 = vmatpush3.msra.mxu1 %v801_v59  ;;  %v1419_v59 = vld [vmem:[#allocation13 + $0x1f0] sm:$0xff] }
 0x2fd   :  { %2483 = vmatprep.subr.mxu1 %v2840_v31 }
 0x2fe   :  { %2484 = vmatpush3.msra.mxu1 %v800_v60  ;;  %v1418_v60 = vld [vmem:[#allocation13 + $0x1e8] sm:$0xff] }
 0x2ff   :  { %2495 = vmatprep.subr.mxu1 %v2840_v31 }
 0x3ab   :  { %v796_v0 = vpop.f32.mrf.mxu1 }
 0x3ac   :  { %2486 = vmatmul.mubr.msk.f32.vlgmr.msra.gmra.mxu1 %vm892_vm5, %v796_v0  ;;  %v1414_v0 = vld [vmem:[#allocation13 + $0x1c8] sm:$0xff] }
 0x3ad   :  { %v2442_v2 = vpop.f32.mrf.mxu1  ;;  %2496 = vmatpush3.msra.mxu1 %v2213_v63  ;;  %2511 = vmatprep.mubr.msk.f32.mxu1 %vm2841_vm3, %v2840_v31  ;;  %v1415_v63 = vld [vmem:[#allocation13 + $0x1d0] sm:$0xff] }
 0x3ae   :  { %2497 = vmatprep.subr.mxu1 %v2840_v31  ;;  %v1412_v2 = vld [vmem:[#allocation13 + $0x1b8] sm:$0xff] }
 0x3af   :  { %v879_v3 = vpop.f32.mrf.mxu1  ;;  %2498 = vmatpush3.msra.mxu1 %v2212_v1  ;;  %v1413_v1 = vld [vmem:[#allocation13 + $0x1c0] sm:$0xff] }
 0x3b0   :  { %2467 = vmatmul.mubr.msk.f32.vlgmr.msra.gmra.mxu0 %vm892_vm5, %v879_v3  ;;  %2499 = vmatprep.subr.mxu1 %v2840_v31  ;;  %v1411_v3 = vld [vmem:[#allocation13 + $0x1b0] sm:$0xff] }
 0x3b1   :  { %2489 = vmatpush3.msra.mxu0 %v724_v48  ;;  %v2449_v5 = vpop.f32.mrf.mxu1  ;;  %2492 = vmatprep.mubr.msk.f32.mxu0 %vm2841_vm3, %v2840_v31  ;;  %v1284_v48 = vld [vmem:[#allocation13 + $0x18] sm:$0xff] }
 0x3b2   :  { %2490 = vmatprep.subr.mxu0 %v2840_v31  ;;  %2500 = vmatpush3.msra.mxu1 %v2211_v4  ;;  %v1410_v4 = vld [vmem:[#allocation13 + $0x1a8] sm:$0xff]  ;;  %v1409_v5 = vld [vmem:[#allocation13 + $0x1a0] sm:$0xff] }
 0x3b3   :  { %2491 = vmatpush3.msra.mxu0 %v3063_v50  ;;  %2501 = vmatprep.subr.mxu1 %v2840_v31 }
 0x3b4   :  { %2493 = vmatmul.mubr.msk.f32.vlgmr.msra.gmra.mxu0 %vm726_vm4, %v1040_v6  ;;  %2514 = vmatprep.subr.mxu0 %v2840_v31  ;;  %v1408_v6 = vld [vmem:[#allocation13 + $0x198] sm:$0xff] }
 0x3b5   :  { %2516 = vmatprep.mubr.msk.f32.mxu0 %vm2841_vm3, %v2840_v31  ;;  %2502 = vmatpush3.msra.mxu1 %v2210_v7  ;;  %v1407_v7 = vld [vmem:[#allocation13 + $0x190] sm:$0xff] }
 0x3b6   :  { %2503 = vmatprep.subr.mxu1 %v2840_v31 }
 0x3b7   :  { %2504 = vmatpush3.msra.mxu1 %v2209_v8  ;;  %v1406_v8 = vld [vmem:[#allocation13 + $0x188] sm:$0xff] }
 0x3b8   :  { %2505 = vmatprep.subr.mxu1 %v2840_v31 }
 0x3b9   :  { %2506 = vmatpush3.msra.mxu1 %v2208_v9  ;;  %v1405_v9 = vld [vmem:[#allocation13 + $0x180] sm:$0xff] }
 0x3ba   :  { %2507 = vmatprep.subr.mxu1 %v2840_v31 }
 0x3bb   :  { %2508 = vmatpush3.msra.mxu1 %v2207_v10  ;;  %v1404_v10 = vld [vmem:[#allocation13 + $0x178] sm:$0xff] }
 0x3bc   :  { %2509 = vmatprep.subr.mxu1 %v2840_v31 }
 0x3bd   :  { %2510 = vmatpush3.msra.mxu1 %v2206_v11  ;;  %v1403_v11 = vld [vmem:[#allocation13 + $0x170] sm:$0xff] }
 0x3be   :  { %1492 = vmatprep.subr.mxu1 %v1312_v19  ;;  %v1395_v19 = vld [vmem:[#allocation13 + $0x130] sm:$0xff] }
 0x46c   :  { %v1035_v12 = vpop.f32.mrf.mxu1 }
 0x46e   :  { %v2487_v13 = vpop.f32.mrf.mxu1 }
 0x46f   :  { %v1401_v13 = vld [vmem:[#allocation13 + $0x160] sm:$0xff] }
 0x470   :  { %v962_v14 = vpop.f32.mrf.mxu0 }
 0x471   :  { %v3160_v15 = vadd.f32 %v1035_v12, %v962_v14  ;;  %v1402_v12 = vld [vmem:[#allocation13 + $0x168] sm:$0xff]  ;;  %v1400_v14 = vld [vmem:[#allocation13 + $0x158] sm:$0xff] }
 0x472   :  { %v2468_v16 = vpop.f32.mrf.mxu0 }
 0x473   :  { %v1398_v16 = vld [vmem:[#allocation13 + $0x148] sm:$0xff] }
 0x474   :  { %v1110_v17 = vpop.f32.mrf.mxu0 }
 0x475   :  { %2512 = vmatmul.mubr.msk.f32.vlgmr.msra.gmra.mxu1 %vm892_vm5, %v1110_v17  ;;  %v1397_v17 = vld [vmem:[#allocation13 + $0x140] sm:$0xff] }
 0x476   :  { %v2494_v18 = vpop.f32.mrf.mxu0  ;;  %1556 = vmatprep.mubr.f32.mxu1 %v2840_v31  ;;  %1493 = vmatpush1.msra.mxu1 %v1311_v20  ;;  %v1394_v20 = vld [vmem:[#allocation13 + $0x128] sm:$0xff] }
 0x477   :  { %1494 = vmatprep.subr.mxu1 %v1310_v21  ;;  %v1396_v18 = vld [vmem:[#allocation13 + $0x138] sm:$0xff]  ;;  %v1393_v21 = vld [vmem:[#allocation13 + $0x120] sm:$0xff] }
 0x478   :  { %1495 = vmatpush1.msra.mxu1 %v1309_v22  ;;  %v1282_v22 = vld [vmem:[#allocation13 + $0x8] sm:$0xff] }
 0x479   :  { %1496 = vmatprep.subr.mxu1 %v1308_v23  ;;  %v1392_v23 = vld [vmem:[#allocation13 + $0x118] sm:$0xff] }
 0x47a   :  { %1497 = vmatpush1.msra.mxu1 %v1307_v24  ;;  %v1391_v24 = vld [vmem:[#allocation13 + $0x110] sm:$0xff] }
 0x47b   :  { %1498 = vmatprep.subr.mxu1 %v1306_v25  ;;  %v1281_v25 = vld [vmem:[#allocation13] sm:$0xff] }
 0x47c   :  { %1499 = vmatpush1.msra.mxu1 %v1305_v26  ;;  %v1390_v26 = vld [vmem:[#allocation13 + $0x108] sm:$0xff] }
 0x47d   :  { %1500 = vmatprep.subr.mxu1 %v1304_v27  ;;  %v1389_v27 = vld [vmem:[#allocation13 + $0x100] sm:$0xff] }
 0x47e   :  { %1501 = vmatpush1.msra.mxu1 %v1303_v28 }
 0x47f   :  { %1502 = vmatprep.subr.mxu1 %v1302_v29 }
 0x480   :  { %1503 = vmatpush1.msra.mxu1 %v1301_v30 }
 0x481   :  { %1504 = vmatprep.subr.mxu1 %v1300_v32  ;;  %v1670_v32 = vld [vmem:[#allocation13 + $0x2f8] sm:$0xff] }
 0x482   :  { %1505 = vmatpush1.msra.mxu1 %v1299_v33 }
 0x483   :  { %1506 = vmatprep.subr.mxu1 %v1298_v34  ;;  %v1564_v34 = vld [vmem:[#allocation11 + $0x8] sm:$0xf] }
 0x484   :  { %1507 = vmatpush1.msra.mxu1 %v1297_v35  ;;  %v1669_v35 = vld [vmem:[#allocation13 + $0x2f0] sm:$0xff] }
 0x485   :  { %1508 = vmatprep.subr.mxu1 %v1296_v36  ;;  %v1668_v36 = vld [vmem:[#allocation13 + $0x2e8] sm:$0xff] }
 0x486   :  { %1509 = vmatpush1.msra.mxu1 %v1295_v37  ;;  %v1667_v37 = vld [vmem:[#allocation13 + $0x2e0] sm:$0xff] }
 0x487   :  { %1510 = vmatprep.subr.mxu1 %v1294_v38  ;;  %v1666_v38 = vld [vmem:[#allocation13 + $0x2d8] sm:$0xff] }
 0x488   :  { %1511 = vmatpush1.msra.mxu1 %v1293_v39  ;;  %v1665_v39 = vld [vmem:[#allocation13 + $0x2d0] sm:$0xff] }
 0x489   :  { %1512 = vmatprep.subr.mxu1 %v1292_v40  ;;  %v1664_v40 = vld [vmem:[#allocation13 + $0x2c8] sm:$0xff] }
 0x48a   :  { %1513 = vmatpush1.msra.mxu1 %v1291_v41  ;;  %v1663_v41 = vld [vmem:[#allocation13 + $0x2c0] sm:$0xff] }
 0x48b   :  { %1514 = vmatprep.subr.mxu1 %v1290_v42  ;;  %v1662_v42 = vld [vmem:[#allocation13 + $0x2b8] sm:$0xff] }
 0x48c   :  { %1515 = vmatpush1.msra.mxu1 %v1289_v43  ;;  %v1661_v43 = vld [vmem:[#allocation13 + $0x2b0] sm:$0xff] }
 0x48d   :  { %1516 = vmatprep.subr.mxu1 %v1288_v44  ;;  %v1660_v44 = vld [vmem:[#allocation13 + $0x2a8] sm:$0xff] }
 0x48e   :  { %1517 = vmatpush1.msra.mxu1 %v1287_v45  ;;  %v1659_v45 = vld [vmem:[#allocation13 + $0x2a0] sm:$0xff] }
 0x48f   :  { %1518 = vmatprep.subr.mxu1 %v1286_v46  ;;  %v1658_v46 = vld [vmem:[#allocation13 + $0x298] sm:$0xff] }
 0x490   :  { %1519 = vmatpush1.msra.mxu1 %v1285_v47  ;;  %v1657_v47 = vld [vmem:[#allocation13 + $0x290] sm:$0xff] }
 0x491   :  { %1520 = vmatprep.subr.mxu1 %v1284_v48  ;;  %v1656_v48 = vld [vmem:[#allocation13 + $0x288] sm:$0xff] }
 0x492   :  { %1521 = vmatpush1.msra.mxu1 %v1283_v49  ;;  %v1655_v49 = vld [vmem:[#allocation13 + $0x280] sm:$0xff] }
 0x493   :  { %1522 = vmatprep.subr.mxu1 %v1282_v22  ;;  %v1781_v22 = vld [vmem:[%s3422_s10 + $0xa8] sm:$0xff] }
 0x494   :  { %1523 = vmatpush1.msra.mxu1 %v1281_v25 }
 0x535   :  { %v1192_v50 = vpop.f32.mrf.mxu1 }
 0x536   :  { %v1196_v52 = vadd.f32 %v1192_v50, %v3160_v15  ;;  %v1399_v15 = vld [vmem:[#allocation13 + $0x150] sm:$0xff]  ;;  %v1654_v50 = vld [vmem:[#allocation13 + $0x278] sm:$0xff] }
 0x537   :  { %v2513_v53 = vpop.f32.mrf.mxu1 }
 0x538   :  { %v1204_v54 = vadd.f32 %v2215_v51, %v1196_v52  ;;  %v1653_v51 = vld [vmem:[#allocation13 + $0x270] sm:$0xff]  ;;  %v1652_v52 = vld [vmem:[#allocation13 + $0x268] sm:$0xff]  ;;  %v1651_v53 = vld [vmem:[#allocation13 + $0x260] sm:$0xff] }
 0x53a   :  { %v3165_v55 = vmax.f32 %v1204_v54, 0.0  ;;  %v1650_v54 = vld [vmem:[#allocation13 + $0x258] sm:$0xff] }
 0x53c   :  { %2515 = vmatpush3.msra.mxu0 %v3165_v55 }
 0x53d   :  { %2517 = vmatmul.mubr.msk.f32.vlgmr.msra.gmra.mxu0 %vm1207_vm6, %v1206_v56  ;;  %2519 = vmatprep.subr.mxu0 %v2840_v31  ;;  %v1648_v56 = vld [vmem:[#allocation13 + $0x248] sm:$0xff] }
 0x53e   :  { %2520 = vmatpush3.msra.mxu0 %v3165_v55  ;;  %2521 = vmatprep.mubr.msk.f32.mxu0 %vm2841_vm3, %v2840_v31 }
 0x53f   :  { %1421 = vmatprep.subr.mxu0 %v1420_v57  ;;  %v1647_v57 = vld [vmem:[#allocation13 + $0x240] sm:$0xff] }
 0x541   :  { %2522 = vmatmul.mubr.msk.f32.vlgmr.msra.gmra.mxu0 %vm1207_vm6, %v1314_v58  ;;  %v1646_v58 = vld [vmem:[#allocation13 + $0x238] sm:$0xff] }
 0x542   :  { %1422 = vmatpush1.msra.mxu0 %v1419_v59  ;;  %1485 = vmatprep.mubr.f32.mxu0 %v2840_v31  ;;  %v1645_v59 = vld [vmem:[#allocation13 + $0x230] sm:$0xff] }
 0x543   :  { %1423 = vmatprep.subr.mxu0 %v1418_v60  ;;  %v1644_v60 = vld [vmem:[#allocation13 + $0x228] sm:$0xff] }
 0x544   :  { %1424 = vmatpush1.msra.mxu0 %v1417_v61  ;;  %v1643_v61 = vld [vmem:[#allocation13 + $0x220] sm:$0xff] }
 0x545   :  { %1425 = vmatprep.subr.mxu0 %v1416_v62  ;;  %v1642_v62 = vld [vmem:[#allocation13 + $0x218] sm:$0xff] }
 0x546   :  { %1426 = vmatpush1.msra.mxu0 %v1415_v63  ;;  %v1641_v63 = vld [vmem:[#allocation13 + $0x210] sm:$0xff] }
 0x547   :  { %1427 = vmatprep.subr.mxu0 %v1414_v0  ;;  %v1640_v0 = vld [vmem:[#allocation13 + $0x208] sm:$0xff] }
 0x548   :  { %1428 = vmatpush1.msra.mxu0 %v1413_v1  ;;  %v1639_v1 = vld [vmem:[#allocation13 + $0x200] sm:$0xff] }
 0x549   :  { %1429 = vmatprep.subr.mxu0 %v1412_v2  ;;  %v1791_v2 = vld [vmem:[%s3422_s10 + $0xf8] sm:$0xff] }
 0x54a   :  { %1430 = vmatpush1.msra.mxu0 %v1411_v3  ;;  %v1775_v3 = vld [vmem:[%s3422_s10 + $0x78] sm:$0xff]  ;;  %2304 = vmatprep.subr.mxu1 %v1791_v2 }
 0x54b   :  { %1431 = vmatprep.subr.mxu0 %v1410_v4  ;;  %v1790_v4 = vld [vmem:[%s3422_s10 + $0xf0] sm:$0xff] }
 0x54c   :  { %1432 = vmatpush1.msra.mxu0 %v1409_v5  ;;  %v1774_v5 = vld [vmem:[%s3422_s10 + $0x70] sm:$0xff] }
 0x54d   :  { %1433 = vmatprep.subr.mxu0 %v1408_v6  ;;  %v1789_v6 = vld [vmem:[%s3422_s10 + $0xe8] sm:$0xff] }
 0x54e   :  { %1434 = vmatpush1.msra.mxu0 %v1407_v7  ;;  %v1773_v7 = vld [vmem:[%s3422_s10 + $0x68] sm:$0xff] }
 0x54f   :  { %1435 = vmatprep.subr.mxu0 %v1406_v8  ;;  %v1788_v8 = vld [vmem:[%s3422_s10 + $0xe0] sm:$0xff] }
 0x550   :  { %1436 = vmatpush1.msra.mxu0 %v1405_v9  ;;  %v1772_v9 = vld [vmem:[%s3422_s10 + $0x60] sm:$0xff] }
 0x551   :  { %1437 = vmatprep.subr.mxu0 %v1404_v10  ;;  %v1787_v10 = vld [vmem:[%s3422_s10 + $0xd8] sm:$0xff] }
 0x552   :  { %1438 = vmatpush1.msra.mxu0 %v1403_v11  ;;  %v1771_v11 = vld [vmem:[%s3422_s10 + $0x58] sm:$0xff] }
 0x553   :  { %1439 = vmatprep.subr.mxu0 %v1402_v12  ;;  %v1786_v12 = vld [vmem:[%s3422_s10 + $0xd0] sm:$0xff] }
 0x554   :  { %1440 = vmatpush1.msra.mxu0 %v1401_v13  ;;  %v1770_v13 = vld [vmem:[%s3422_s10 + $0x50] sm:$0xff] }
 0x555   :  { %1441 = vmatprep.subr.mxu0 %v1400_v14  ;;  %v1785_v14 = vld [vmem:[%s3422_s10 + $0xc8] sm:$0xff] }
 0x556   :  { %1442 = vmatpush1.msra.mxu0 %v1399_v15  ;;  %v1769_v15 = vld [vmem:[%s3422_s10 + $0x48] sm:$0xff] }
 0x557   :  { %1443 = vmatprep.subr.mxu0 %v1398_v16  ;;  %v1784_v16 = vld [vmem:[%s3422_s10 + $0xc0] sm:$0xff] }
 0x558   :  { %1444 = vmatpush1.msra.mxu0 %v1397_v17  ;;  %v1768_v17 = vld [vmem:[%s3422_s10 + $0x40] sm:$0xff] }
 0x559   :  { %1445 = vmatprep.subr.mxu0 %v1396_v18  ;;  %v1783_v18 = vld [vmem:[%s3422_s10 + $0xb8] sm:$0xff] }
 0x55a   :  { %1446 = vmatpush1.msra.mxu0 %v1395_v19  ;;  %v1767_v19 = vld [vmem:[%s3422_s10 + $0x38] sm:$0xff] }
 0x55b   :  { %1447 = vmatprep.subr.mxu0 %v1394_v20  ;;  %v1782_v20 = vld [vmem:[%s3422_s10 + $0xb0] sm:$0xff] }
 0x55c   :  { %1448 = vmatpush1.msra.mxu0 %v1393_v21  ;;  %v1766_v21 = vld [vmem:[%s3422_s10 + $0x30] sm:$0xff] }
 0x55d   :  { %1449 = vmatprep.subr.mxu0 %v1392_v23  ;;  %v1765_v23 = vld [vmem:[%s3422_s10 + $0x28] sm:$0xff] }
 0x55e   :  { %1450 = vmatpush1.msra.mxu0 %v1391_v24 }
 0x55f   :  { %1451 = vmatprep.subr.mxu0 %v1390_v26 }
 0x560   :  { %1452 = vmatpush1.msra.mxu0 %v1389_v27 }
 0x561   :  { %2524 = vmatprep.subr.mxu0 %v2840_v31 }
 0x5fd   :  { %v1277_v28 = vpop.f32.mrf.mxu0 }
 0x5fe   :  { %1557 = vmatmul.mubr.f32.vlgmr.msra.gmra.mxu1 %v1277_v28  ;;  %v1780_v28 = vld [vmem:[%s3422_s10 + $0xa0] sm:$0xff] }
 0x5ff   :  { %v2518_v29 = vpop.f32.mrf.mxu0  ;;  %2305 = vmatpush3.msra.mxu1 %v1775_v3 }
 0x600   :  { %2306 = vmatprep.subr.mxu1 %v1790_v4  ;;  %v1764_v29 = vld [vmem:[%s3422_s10 + $0x20] sm:$0xff] }
 0x601   :  { %v1384_v30 = vpop.f32.mrf.mxu0  ;;  %2307 = vmatpush3.msra.mxu1 %v1774_v5  ;;  %v1874_v5 = vld [vmem:[%s3424_s12 + $0x20] sm:$0xff] }
 0x602   :  { %1486 = vmatmul.mubr.f32.vlgmr.msra.gmra.mxu0 %v1384_v30  ;;  %2308 = vmatprep.subr.mxu1 %v1789_v6  ;;  %v1779_v30 = vld [vmem:[%s3422_s10 + $0x98] sm:$0xff] }
 0x603   :  { %2525 = vmatpush3.msra.mxu0 %v3165_v55  ;;  %v2523_v33 = vpop.f32.mrf.mxu0  ;;  %2526 = vmatprep.mubr.msk.f32.mxu0 %vm2841_vm3, %v2840_v31  ;;  %v1649_v55 = vld [vmem:[#allocation13 + $0x250] sm:$0xff]  ;;  %v1873_v6 = vld [vmem:[%s3424_s12 + $0x18] sm:$0xff] }
 0x604   :  { %1671 = vmatprep.subr.mxu0 %v1670_v32  ;;  %2309 = vmatpush3.msra.mxu1 %v1773_v7  ;;  %v1763_v32 = vld [vmem:[%s3422_s10 + $0x18] sm:$0xff]  ;;  %v1778_v33 = vld [vmem:[%s3422_s10 + $0x90] sm:$0xff] }
 0x605   :  { %2310 = vmatprep.subr.mxu1 %v1788_v8  ;;  %v1872_v7 = vld [vmem:[%s3424_s12 + $0x10] sm:$0xff]  ;;  %v1871_v8 = vld [vmem:[%s3424_s12 + $0x8] sm:$0xff] }
 0x606   :  { %2527 = vmatmul.mubr.msk.f32.vlgmr.msra.gmra.mxu0 %vm1207_vm6, %v1564_v34  ;;  %2311 = vmatpush3.msra.mxu1 %v1772_v9  ;;  %v1762_v34 = vld [vmem:[%s3422_s10 + $0x10] sm:$0xff]  ;;  %v1870_v9 = vld [vmem:[%s3424_s12] sm:$0xff] }
 0x607   :  { %1672 = vmatpush1.msra.mxu0 %v1669_v35  ;;  %1735 = vmatprep.mubr.f32.mxu0 %v2840_v31  ;;  %v1777_v35 = vld [vmem:[%s3422_s10 + $0x88] sm:$0xff] }
 0x608   :  { %1673 = vmatprep.subr.mxu0 %v1668_v36  ;;  %2312 = vmatprep.subr.mxu1 %v1787_v10  ;;  %v1761_v36 = vld [vmem:[%s3422_s10 + $0x8] sm:$0xff]  ;;  %v1971_v10 = vld [vmem:[%s3426_s14 + $0x38] sm:$0xff] }
 0x609   :  { %1674 = vmatpush1.msra.mxu0 %v1667_v37  ;;  %2313 = vmatpush3.msra.mxu1 %v1771_v11  ;;  %v1776_v37 = vld [vmem:[%s3422_s10 + $0x80] sm:$0xff]  ;;  %v1970_v11 = vld [vmem:[%s3426_s14 + $0x30] sm:$0xff] }
 0x60a   :  { %1675 = vmatprep.subr.mxu0 %v1666_v38  ;;  %2314 = vmatprep.subr.mxu1 %v1786_v12  ;;  %v1760_v38 = vld [vmem:[%s3422_s10] sm:$0xff]  ;;  %v1969_v12 = vld [vmem:[%s3426_s14 + $0x28] sm:$0xff] }
 0x60b   :  { %1676 = vmatpush1.msra.mxu0 %v1665_v39  ;;  %2315 = vmatpush3.msra.mxu1 %v1770_v13  ;;  %v1885_v39 = vld [vmem:[%s3424_s12 + $0x78] sm:$0xff]  ;;  %v1968_v13 = vld [vmem:[%s3426_s14 + $0x20] sm:$0xff] }
 0x60c   :  { %1677 = vmatprep.subr.mxu0 %v1664_v40  ;;  %2316 = vmatprep.subr.mxu1 %v1785_v14  ;;  %v1884_v40 = vld [vmem:[%s3424_s12 + $0x70] sm:$0xff]  ;;  %v1967_v14 = vld [vmem:[%s3426_s14 + $0x18] sm:$0xff] }
 0x60d   :  { %1678 = vmatpush1.msra.mxu0 %v1663_v41  ;;  %2317 = vmatpush3.msra.mxu1 %v1769_v15  ;;  %v1883_v41 = vld [vmem:[%s3424_s12 + $0x68] sm:$0xff] }
 0x60e   :  { %1679 = vmatprep.subr.mxu0 %v1662_v42  ;;  %2318 = vmatprep.subr.mxu1 %v1784_v16  ;;  %v1882_v42 = vld [vmem:[%s3424_s12 + $0x60] sm:$0xff]  ;;  %v2219_v16 = vld [vmem:[#allocation16] ss:$0 sm:$0xff] }
 0x60f   :  { %1680 = vmatpush1.msra.mxu0 %v1661_v43  ;;  %2319 = vmatpush3.msra.mxu1 %v1768_v17  ;;  %v1881_v43 = vld [vmem:[%s3424_s12 + $0x58] sm:$0xff] }
 0x610   :  { %1681 = vmatprep.subr.mxu0 %v1660_v44  ;;  %2320 = vmatprep.subr.mxu1 %v1783_v18  ;;  %v1880_v44 = vld [vmem:[%s3424_s12 + $0x50] sm:$0xff] }
 0x611   :  { %1682 = vmatpush1.msra.mxu0 %v1659_v45  ;;  %2321 = vmatpush3.msra.mxu1 %v1767_v19  ;;  %v1879_v45 = vld [vmem:[%s3424_s12 + $0x48] sm:$0xff] }
 0x612   :  { %1683 = vmatprep.subr.mxu0 %v1658_v46  ;;  %2322 = vmatprep.subr.mxu1 %v1782_v20  ;;  %v1878_v46 = vld [vmem:[%s3424_s12 + $0x40] sm:$0xff] }
 0x613   :  { %1684 = vmatpush1.msra.mxu0 %v1657_v47  ;;  %2323 = vmatpush3.msra.mxu1 %v1766_v21  ;;  %v1877_v47 = vld [vmem:[%s3424_s12 + $0x38] sm:$0xff]  ;;  %v1966_v21 = vld [vmem:[%s3426_s14 + $0x10] sm:$0xff] }
 0x614   :  { %1685 = vmatprep.subr.mxu0 %v1656_v48  ;;  %2324 = vmatprep.subr.mxu1 %v1781_v22  ;;  %v1876_v48 = vld [vmem:[%s3424_s12 + $0x30] sm:$0xff]  ;;  %v1965_v22 = vld [vmem:[%s3426_s14 + $0x8] sm:$0xff] }
 0x615   :  { %1686 = vmatpush1.msra.mxu0 %v1655_v49  ;;  %2325 = vmatpush3.msra.mxu1 %v1765_v23  ;;  %v1875_v49 = vld [vmem:[%s3424_s12 + $0x28] sm:$0xff]  ;;  %v1964_v23 = vld [vmem:[%s3426_s14] sm:$0xff] }
 0x616   :  { %1687 = vmatprep.subr.mxu0 %v1654_v50  ;;  %2326 = vmatprep.subr.mxu1 %v1780_v28  ;;  %v1746_v50 = vlaneseq }
 0x617   :  { %1688 = vmatpush1.msra.mxu0 %v1653_v51  ;;  %2327 = vmatpush3.msra.mxu1 %v1764_v29  ;;  %v2079_v29 = vld [vmem:[%s3428_s16 + $0x18] sm:$0xff] }
 0x618   :  { %1689 = vmatprep.subr.mxu0 %v1652_v52  ;;  %2328 = vmatprep.subr.mxu1 %v1779_v30  ;;  %v1747_v51 = vshrl.u32 %v1746_v50, 7  ;;  %v2078_v30 = vld [vmem:[%s3428_s16 + $0x10] sm:$0xff] }
 0x619   :  { %1690 = vmatpush1.msra.mxu0 %v1651_v53  ;;  %2329 = vmatpush3.msra.mxu1 %v1763_v32  ;;  %v2077_v32 = vld [vmem:[%s3428_s16 + $0x8] sm:$0xff] }
 0x61a   :  { %1691 = vmatprep.subr.mxu0 %v1650_v54  ;;  %2330 = vmatprep.subr.mxu1 %v1778_v33  ;;  %v1748_v53 = vsub.s32 0, %v1747_v51  ;;  %v1744_v54 = vld [vmem:[#allocation14] sm:$0x3]  ;;  %v2076_v33 = vld [vmem:[%s3428_s16] sm:$0xff] }
 0x61b   :  { %1692 = vmatpush1.msra.mxu0 %v1649_v55  ;;  %2331 = vmatpush3.msra.mxu1 %v1762_v34  ;;  %v1752_v55 = vsub.s32 1, %v1747_v51  ;;  %v2221_v34 = vld [vmem:[%s3427_s15] ss:$0 sm:$0xff] }
 0x61c   :  { %1693 = vmatprep.subr.mxu0 %v1648_v56  ;;  %2332 = vmatprep.subr.mxu1 %v1777_v35 }
 0x61d   :  { %1694 = vmatpush1.msra.mxu0 %v1647_v57  ;;  %2333 = vmatpush3.msra.mxu1 %v1761_v36 }
 0x61e   :  { %1695 = vmatprep.subr.mxu0 %v1646_v58  ;;  %2334 = vmatprep.subr.mxu1 %v1776_v37 }
 0x61f   :  { %1696 = vmatpush1.msra.mxu0 %v1645_v59  ;;  %2335 = vmatpush3.msra.mxu1 %v1760_v38  ;;  %v1749_v59 = vrot.slane %v1744_v54, %v1748_v53 }
 0x620   :  { %1697 = vmatprep.subr.mxu0 %v1644_v60  ;;  %2564 = vmatprep.subr.mxu1 %v2840_v31 }
 0x621   :  { %1698 = vmatpush1.msra.mxu0 %v1643_v61 }
 0x622   :  { %1699 = vmatprep.subr.mxu0 %v1642_v62  ;;  %v1753_v62 = vrot.slane %v1744_v54, %v1752_v55 }
 0x623   :  { %1700 = vmatpush1.msra.mxu0 %v1641_v63 }
 0x624   :  { %1701 = vmatprep.subr.mxu0 %v1640_v0 }
 0x625   :  { %1702 = vmatpush1.msra.mxu0 %v1639_v1 }
 0x626   :  { %2529 = vmatprep.subr.mxu0 %v2840_v31 }
 0x6be   :  { %v1558_v52 = vpop.f32.mrf.mxu1 }
 0x6c0   :  { %v1560_v57 = vpop.f32.mrf.mxu1 }
 0x6c2   :  { %v3248_v24 = vpop.f32.mrf.mxu0 }
 0x6c3   :  { %v1559_v56 = vadd.f32 %v1558_v52, %v3248_v24  ;;  %v2220_v24 = vld [vmem:[#allocation17] ss:$0 sm:$0xff] }
 0x6c4   :  { %v3250_v25 = vpop.f32.mrf.mxu0 }
 0x6c5   :  { %v1561_v60 = vadd.f32 %v1560_v57, %v3250_v25 }
 0x6c6   :  { %v1634_v26 = vpop.f32.mrf.mxu0 }
 0x6c7   :  { %1736 = vmatmul.mubr.f32.vlgmr.msra.gmra.mxu0 %v1634_v26 }
 0x6c8   :  { %v2528_v27 = vpop.f32.mrf.mxu0  ;;  %2561 = vmatprep.mubr.msk.f32.mxu0 %vm2841_vm3, %v2840_v31  ;;  %2530 = vmatpush3.msra.mxu0 %v1885_v39 }
 0x6c9   :  { %2531 = vmatprep.subr.mxu0 %v2840_v31 }
 0x6ca   :  { %2532 = vmatpush3.msra.mxu0 %v1884_v40 }
 0x6cb   :  { %2533 = vmatprep.subr.mxu0 %v2840_v31 }
 0x6cc   :  { %2534 = vmatpush3.msra.mxu0 %v1883_v41 }
 0x6cd   :  { %2535 = vmatprep.subr.mxu0 %v2840_v31 }
 0x6ce   :  { %2536 = vmatpush3.msra.mxu0 %v1882_v42 }
 0x6cf   :  { %2537 = vmatprep.subr.mxu0 %v2840_v31 }
 0x6d0   :  { %2538 = vmatpush3.msra.mxu0 %v1881_v43 }
 0x6d1   :  { %2539 = vmatprep.subr.mxu0 %v2840_v31 }
 0x6d2   :  { %2540 = vmatpush3.msra.mxu0 %v1880_v44 }
 0x6d3   :  { %2541 = vmatprep.subr.mxu0 %v2840_v31 }
 0x6d4   :  { %2542 = vmatpush3.msra.mxu0 %v1879_v45 }
 0x6d5   :  { %2543 = vmatprep.subr.mxu0 %v2840_v31 }
 0x6d6   :  { %2544 = vmatpush3.msra.mxu0 %v1878_v46 }
 0x6d7   :  { %2545 = vmatprep.subr.mxu0 %v2840_v31 }
 0x6d8   :  { %2546 = vmatpush3.msra.mxu0 %v1877_v47 }
 0x6d9   :  { %2547 = vmatprep.subr.mxu0 %v2840_v31 }
 0x6da   :  { %2548 = vmatpush3.msra.mxu0 %v1876_v48 }
 0x6db   :  { %2549 = vmatprep.subr.mxu0 %v2840_v31 }
 0x6dc   :  { %2550 = vmatpush3.msra.mxu0 %v1875_v49 }
 0x6dd   :  { %2551 = vmatprep.subr.mxu0 %v2840_v31 }
 0x6de   :  { %2552 = vmatpush3.msra.mxu0 %v1874_v5 }
 0x6df   :  { %2553 = vmatprep.subr.mxu0 %v2840_v31 }
 0x6e0   :  { %2554 = vmatpush3.msra.mxu0 %v1873_v6 }
 0x6e1   :  { %2555 = vmatprep.subr.mxu0 %v2840_v31 }
 0x6e2   :  { %2556 = vmatpush3.msra.mxu0 %v1872_v7 }
 0x6e3   :  { %2557 = vmatprep.subr.mxu0 %v2840_v31 }
 0x6e4   :  { %2558 = vmatpush3.msra.mxu0 %v1871_v8 }
 0x6e5   :  { %2559 = vmatprep.subr.mxu0 %v2840_v31 }
 0x6e6   :  { %2560 = vmatpush3.msra.mxu0 %v1870_v9 }
 0x787   :  { %v1737_v58 = vpop.f32.mrf.mxu0 }
 0x788   :  { %v1742_v61 = vadd.f32 %v1737_v58, %v1559_v56  ;;  %v2223_v56 = vld [vmem:[#allocation2] ss:$0 sm:$0xff] }
 0x789   :  { %v1739_v63 = vpop.f32.mrf.mxu0 }
 0x78a   :  { %v1743_v0 = vadd.f32 %v1739_v63, %v1561_v60  ;;  %v1756_v1 = vadd.f32 %v1749_v59, %v1742_v61 }
 0x78c   :  { %v1757_v2 = vadd.f32 %v1753_v62, %v1743_v0  ;;  %v1758_v4 = vmax.f32 %v1756_v1, 0.0 }
 0x78e   :  { %v1759_v3 = vmax.f32 %v1757_v2, 0.0 }
 0x790   :  { %1863 = vmatprep.mubr.f32.mxu1 %v1759_v3 }
 0x791   :  { %1864 = vmatmul.mubr.f32.vlgmr.msra.gmra.mxu1 %v1758_v4 }
 0x792   :  { %2580 = vmatprep.mubr.msk.f32.mxu1 %vm2841_vm3, %v2840_v31  ;;  %2565 = vmatpush3.msra.mxu1 %v1971_v10 }
 0x793   :  { %2566 = vmatprep.subr.mxu1 %v2840_v31 }
 0x794   :  { %2567 = vmatpush3.msra.mxu1 %v1970_v11 }
 0x795   :  { %2568 = vmatprep.subr.mxu1 %v2840_v31 }
 0x796   :  { %2569 = vmatpush3.msra.mxu1 %v1969_v12 }
 0x797   :  { %2570 = vmatprep.subr.mxu1 %v2840_v31 }
 0x798   :  { %2571 = vmatpush3.msra.mxu1 %v1968_v13 }
 0x799   :  { %2572 = vmatprep.subr.mxu1 %v2840_v31 }
 0x79a   :  { %2573 = vmatpush3.msra.mxu1 %v1967_v14 }
 0x79b   :  { %2574 = vmatprep.subr.mxu1 %v2840_v31 }
 0x79c   :  { %2575 = vmatpush3.msra.mxu1 %v1966_v21 }
 0x79d   :  { %2576 = vmatprep.subr.mxu1 %v2840_v31 }
 0x79e   :  { %2577 = vmatpush3.msra.mxu1 %v1965_v22 }
 0x79f   :  { %2578 = vmatprep.subr.mxu1 %v2840_v31 }
 0x7a0   :  { %2579 = vmatpush3.msra.mxu1 %v1964_v23 }
 0x7a1   :  { %2583 = vmatprep.subr.mxu1 %v2840_v31 }
 0x851   :  { %v2336_v15 = vpop.f32.mrf.mxu1 }
 0x853   :  { %v2337_v17 = vpop.f32.mrf.mxu1 }
 0x854   :  { %v2338_v18 = vadd.f32 %v2337_v17, %v2336_v15 }
 0x856   :  { %v1866_v19 = vadd.f32 %v2338_v18, %v2219_v16 }
 0x858   :  { %v1869_v20 = vmax.f32 %v1866_v19, 0.0 }
 0x85a   :  { %2562 = vmatmul.mubr.f32.vlgmr.msra.gmra.mxu0 %v1869_v20 }
 0x91a   :  { %v1959_v25 = vpop.f32.mrf.mxu0 }
 0x91b   :  { %v1960_v26 = vadd.f32 %v2220_v24, %v1959_v25 }
 0x91c   :  { %v2563_v27 = vpop.f32.mrf.mxu0 }
 0x91d   :  { %v1963_v28 = vmax.f32 %v1960_v26, 0.0 }
 0x91f   :  { %2581 = vmatmul.mubr.msk.f32.vlgmr.msra.gmra.mxu1 %vm892_vm5, %v1963_v28 }
 0x920   :  { %2591 = vmatprep.mubr.msk.f32.mxu1 %vm2841_vm3, %v2840_v31  ;;  %2584 = vmatpush3.msra.mxu1 %v2079_v29 }
 0x921   :  { %2585 = vmatprep.subr.mxu1 %v2840_v31 }
 0x922   :  { %2586 = vmatpush3.msra.mxu1 %v2078_v30 }
 0x923   :  { %2587 = vmatprep.subr.mxu1 %v2840_v31 }
 0x924   :  { %2588 = vmatpush3.msra.mxu1 %v2077_v32 }
 0x925   :  { %2589 = vmatprep.subr.mxu1 %v2840_v31 }
 0x926   :  { %2590 = vmatpush3.msra.mxu1 %v2076_v33 }
 0x9df   :  { %v2048_v35 = vpop.f32.mrf.mxu1 }
 0x9e0   :  { %v2049_v36 = vadd.f32 %v2221_v34, %v2048_v35 }
 0x9e1   :  { %v2582_v37 = vpop.f32.mrf.mxu1 }
 0x9e2   :  { %v2052_v38 = vmax.f32 %v2049_v36, 0.0 }
 0x9e4   :  { %v2054_v39 = vsel %vm2053_vm7, %v2052_v38, 0.0  ;;  %v2064_v40 = vrot.slane %v2052_v38, 2 }
 0x9e5   :  { %v2055_v41 = vrot.slane %v2054_v39, 4 }
 0x9e6   :  { %v2066_v42 = vsel %vm2053_vm7, %v2064_v40, 0.0 }
 0x9e7   :  { %v2056_v43 = vadd.f32 %v2055_v41, %v2054_v39  ;;  %v2067_v44 = vrot.slane %v2066_v42, 4 }
 0x9e9   :  { %v2057_v45 = vrot.slane %v2056_v43, 2  ;;  %v2068_v46 = vadd.f32 %v2067_v44, %v2066_v42 }
 0x9eb   :  { %v2058_v47 = vadd.f32 %v2057_v45, %v2056_v43  ;;  %v2069_v31 = vrot.slane %v2068_v46, 2 }
 0x9ed   :  { %v2059_v48 = vrot.slane %v2058_v47, 1  ;;  %v2070_v49 = vadd.f32 %v2069_v31, %v2068_v46 }
 0x9ef   :  { %v2060_v50 = vadd.f32 %v2059_v48, %v2058_v47  ;;  %v2071_v51 = vrot.slane %v2070_v49, 1 }
 0x9f1   :  { %v2072_v52 = vadd.f32 %v2071_v51, %v2070_v49  ;;  %v2062_v53 = vmul.f32 0.5, %v2060_v50 }
 0x9f3   :  { %v2073_v54 = vmul.f32 0.5, %v2072_v52 }
 0x9f5   :  { %v2075_v55 = vsel %vm2074_vm8, %v2062_v53, %v2073_v54 }
 0x9f6   :  { %2592 = vmatmul.mubr.msk.f32.vlgmr.msra.gmra.mxu1 %vm194_vm0, %v2075_v55 }
 0xab6   :  { %v2156_v57 = vpop.f32.mrf.mxu1 }
 0xab7   :  { %v2157_v58 = vadd.f32 %v2223_v56, %v2156_v57 }
 0xab8   :  { %v2593_v59 = vpop.f32.mrf.mxu1 }
 0xab9   :  { %2161 = vst.msk [vmem:[%s3430_s18] sm:$0x1] %vm2160_vm9, %v2157_v58 }
 0xaba   :  { %2225 = vst.msk [vmem:[%s3430_s18] sm:$0x2] %vm2163_vm10, %v2157_v58 }
 0xabb   :  { %2169 = vsyncpa [#allocation4], 1 }
 0xabc   :  { %2170 = vsyncpa [#allocation6], 1 }
 0xabd   :  { %2171 = vsyncpa [#allocation9], 1 }
 0xabe   :  { %2172 = vsyncpa [#allocation12], 1 }
 0xabf   :  { %2173 = vsyncpa [#allocation15], 1 }
 0xac0   :  { %2174 = vsyncpa [#allocation18], 1 }

</bundles_post_ra>
